<compile_context>
chip_gen: v7x
topology: tpu7x:2x2x1
jax: 0.10.0
libtpu: 0.0.40
codegen_flags: <defaults>
</compile_context>

<pallas_src>
import numpy as np
import jax
import jax.numpy as jnp
from jax.experimental import pallas as pl
from jax.experimental.pallas import tpu as pltpu


NUM_GROUPS = 32
EPS = 1e-6
_MiB = 1024 * 1024


# ----------------------------- host-side sizing -----------------------------

def _tpu_vmem_capacity_bytes():
    """Physical VMEM per TensorCore (64 MiB on v7x, 128 MiB on v5e/v6e)."""
    try:
        info = pltpu.get_tpu_info()
        cap = int(getattr(info, "vmem_capacity_bytes", 128 * _MiB))
        if cap > 0:
            return cap
    except Exception:
        pass
    return 128 * _MiB


def _pick_q_chunk(n, target):
    """Largest divisor of n that is <= target and a multiple of 16 (else n)."""
    if n <= target:
        return n
    for qc in range(target, 15, -1):
        if n % qc == 0 and qc % 16 == 0:
            return qc
    return n


def _per_frame_vmem_bytes(n, c, qc):
    """Peak live VMEM per (b, t) frame with chunked attention (bytes)."""
    io = 2 * 4 * n * c + 2 * 4 * qc * c          # double-buffered x block + out block
    scratch = 3 * 2 * n * c                      # bf16 q/k/v frame-resident scratch
    transient = 4 * n * c + 4 * n * c            # fp32 nhat + one fp32 projection (chunk 0)
    chunk = (4 + 2) * qc * n + 2 * 4 * qc * c    # fp32 logits + bf16 p + fp32 attn/out
    return io + scratch + transient + chunk


def _pick_frames_per_block(bt, n, c, qc, budget_bytes, min_grid_steps):
    """Frames per grid step: fits the VMEM budget, divides BT, keeps >= min steps."""
    per_frame = max(_per_frame_vmem_bytes(n, c, qc), 1)
    cap = max(1, min(bt, budget_bytes // per_frame))
    if bt >= min_grid_steps:
        cap = min(cap, bt // min_grid_steps)
    cap = max(cap, 1)
    for tb in range(cap, 0, -1):
        if bt % tb == 0:
            return tb
    return 1


# --------------------------------- kernel -----------------------------------

def attn_block_kernel(x_ref, gmat_ref,
                      wq_ref, bq_ref, wk_ref, bk_ref, wv_ref, bv_ref,
                      wp_ref, bp_ref, o_ref,
                      q_scr, k_scr, v_scr):
    ci = pl.program_id(1)                     # query-chunk index (inner grid axis)
    TB, N, C = x_ref.shape
    qc = o_ref.shape[1]

    # ---- once per frame block: GroupNorm stats + bf16 Q/K/V into scratch ----
    @pl.when(ci == 0)
    def _():
        x = x_ref[...]                                    # (TB, N, C) fp32
        inv_n = 1.0 / N
        mean_c = jnp.sum(x, axis=1) * inv_n               # (TB, C) per-channel mean
        msq_c = jnp.sum(x * x, axis=1) * inv_n            # (TB, C) per-channel E[x^2]
        # gmat averages channel stats within each group and broadcasts to channels.
        gmean = jnp.dot(mean_c, gmat_ref[...], preferred_element_type=jnp.float32)
        gmsq = jnp.dot(msq_c, gmat_ref[...], preferred_element_type=jnp.float32)
        gvar = jnp.maximum(gmsq - gmean * gmean, 0.0)     # clamp: no rsqrt of negative
        inv_std = jax.lax.rsqrt(gvar + EPS)
        nhat = ((x - gmean[:, None, :]) * inv_std[:, None, :]).astype(jnp.bfloat16)
        nhat2 = nhat.reshape(TB * N, C)
        # gamma/beta and the C^-0.5 scale are folded into the weights/biases on host.

        def proj(w_ref, b_ref):
            y = jnp.dot(nhat2, w_ref[...], preferred_element_type=jnp.float32)
            return (y + b_ref[...]).astype(jnp.bfloat16).reshape(TB, N, C)

        q_scr[...] = proj(wq_ref, bq_ref)                 # already scaled by C^-0.5
        k_scr[...] = proj(wk_ref, bk_ref)
        v_scr[...] = proj(wv_ref, bv_ref)

    # ---- per chunk: (qc, N) logits -> softmax -> P@V -> proj -> residual ----
    start = pl.multiple_of(ci * qc, qc)
    qch = q_scr[:, pl.ds(start, qc), :]                   # (TB, qc, C) bf16
    # NOTE: k_scr is kept in (TB, N, C); if a bundle dump shows a per-chunk K
    # relayout, materializing K^T (TB, C, N) once at ci == 0 would hoist it.
    logits = jnp.einsum("bnc,bmc->bnm", qch, k_scr[...],
                        preferred_element_type=jnp.float32)        # (TB, qc, N) fp32
    m = jnp.max(logits, axis=-1, keepdims=True)
    p = jnp.exp(logits - m)
    s = jnp.sum(p, axis=-1, keepdims=True)                         # fp32 row sums
    attn = jnp.einsum("bnm,bmc->bnc", p.astype(jnp.bfloat16), v_scr[...],
                      preferred_element_type=jnp.float32)          # (TB, qc, C)
    attn = attn * pl.reciprocal(s, approx=True)                    # deferred softmax norm
    out = jnp.dot(attn.reshape(TB * qc, C).astype(jnp.bfloat16), wp_ref[...],
                  preferred_element_type=jnp.float32) + bp_ref[...]
    o_ref[...] = x_ref[:, pl.ds(start, qc), :] + out.reshape(TB, qc, C)   # fp32 residual


# ------------------------------ pallas_call ----------------------------------

def _build_call(BT, N, C, tb, qc, vmem_limit, buffered_consts=True):
    nb = BT // tb
    nc = N // qc

    def const_spec(shape):
        idx = lambda b, ci: (0,) * len(shape)
        if buffered_consts:
            try:
                # constants never change across the grid: single-buffer them
                return pl.BlockSpec(shape, idx, pipeline_mode=pl.Buffered(1))
            except TypeError:
                pass  # pipeline_mode kwarg unsupported in this JAX version
        return pl.BlockSpec(shape, idx)

    grid_spec = pltpu.PrefetchScalarGridSpec(
        num_scalar_prefetch=0,
        grid=(nb, nc),
        in_specs=[
            pl.BlockSpec((tb, N, C), lambda b, ci: (b, 0, 0)),  # x (fp32, frame-resident)
            const_spec((C, C)),                                 # group-average matrix (fp32)
            const_spec((C, C)), const_spec((1, C)),             # Wq^T (bf16), bq (fp32)
            const_spec((C, C)), const_spec((1, C)),             # Wk^T, bk
            const_spec((C, C)), const_spec((1, C)),             # Wv^T, bv
            const_spec((C, C)), const_spec((1, C)),             # Wp^T, bp
        ],
        out_specs=pl.BlockSpec((tb, qc, C), lambda b, ci: (b, ci, 0)),
        scratch_shapes=[
            pltpu.VMEM((tb, N, C), jnp.bfloat16),   # q
            pltpu.VMEM((tb, N, C), jnp.bfloat16),   # k
            pltpu.VMEM((tb, N, C), jnp.bfloat16),   # v
        ],
    )
    return pl.pallas_call(
        attn_block_kernel,
        out_shape=jax.ShapeDtypeStruct((BT, N, C), jnp.float32),
        grid_spec=grid_spec,
        compiler_params=pltpu.CompilerParams(
            dimension_semantics=("parallel", "arbitrary"),   # BT sharded, chunks sequential
            vmem_limit_bytes=int(vmem_limit),
        ),
    )


def attn_block_forward(x, params):
    """x: (B, C, T, H, W) float32 -> same shape."""
    B, C, T, H, W = x.shape
    N = H * W
    BT = B * T
    assert C % NUM_GROUPS == 0

    # NCTHW -> (BT, N, C), channels in the lane axis.
    # TODO(synk): accept a channels-last (B, T, H, W, C) input to drop these two
    # full-tensor HBM transpose passes when the surrounding model can provide it.
    xk = jnp.transpose(x, (0, 2, 3, 4, 1)).reshape(BT, N, C)

    # group-averaging matrix: gmat[i, j] = 1/Cg if channels i, j share a group
    Cg = C // NUM_GROUPS
    gid = np.arange(C) // Cg
    gmat = jnp.asarray((gid[:, None] == gid[None, :]).astype(np.float32) / Cg)

    gamma = params["gamma"].reshape(C).astype(jnp.float32)
    beta = params["beta"].reshape(C).astype(jnp.float32)
    scale = float(C) ** (-0.5)

    def conv_as_matmul(w, b):
        # Conv2d 1x1 weight (C_out, C_in, 1, 1) -> matmul operand (C_in, C_out)
        return w.reshape(C, C).T.astype(jnp.float32), b.reshape(C).astype(jnp.float32)

    wq_t, bq = conv_as_matmul(params["wq"], params["bq"])
    wk_t, bk = conv_as_matmul(params["wk"], params["bk"])
    wv_t, bv = conv_as_matmul(params["wv"], params["bv"])
    wp_t, bp = conv_as_matmul(params["wp"], params["bp"])

    # Fold GroupNorm affine (gamma, beta) and the attention scale into Q/K/V:
    #   conv(nhat*gamma + beta) = nhat @ (gamma[:,None] * W^T) + (beta @ W^T + b)
    wq_b = ((gamma[:, None] * wq_t) * scale).astype(jnp.bfloat16)
    bq2 = ((beta @ wq_t + bq) * scale).reshape(1, C)
    wk_b = (gamma[:, None] * wk_t).astype(jnp.bfloat16)
    bk2 = (beta @ wk_t + bk).reshape(1, C)
    wv_b = (gamma[:, None] * wv_t).astype(jnp.bfloat16)
    bv2 = (beta @ wv_t + bv).reshape(1, C)
    wp_b = wp_t.astype(jnp.bfloat16)
    bp2 = bp.reshape(1, C)

    # generation-aware VMEM budgets / tiling
    cap = _tpu_vmem_capacity_bytes()
    vmem_limit = max(min(cap - 16 * _MiB, 100 * _MiB), 32 * _MiB)
    small_vmem = cap <= 64 * _MiB                       # v7x-class TensorCore
    qc = _pick_q_chunk(N, target=256 if small_vmem else 512)
    min_steps = 4 if small_vmem else 2
    const_bytes = 2 * (4 * C * C + 4 * 2 * C * C + 5 * 4 * C)   # pessimistic (2x buffered)
    budget = max(vmem_limit - const_bytes - 4 * _MiB, 2 * _MiB)
    tb = _pick_frames_per_block(BT, N, C, qc, budget, min_steps)

    args = (xk, gmat, wq_b, bq2, wk_b, bk2, wv_b, bv2, wp_b, bp2)
    try:
        y = _build_call(BT, N, C, tb, qc, vmem_limit, buffered_consts=True)(*args)
    except Exception as e:
        # Only retry without single-buffered constants for Buffered-specific failures;
        # genuine compile/VMEM errors propagate.
        retryable = isinstance(e, (TypeError, NotImplementedError)) or any(
            t in str(e) for t in ("Buffered", "pipeline_mode", "buffer_count"))
        if not retryable:
            raise
        y = _build_call(BT, N, C, tb, qc, vmem_limit, buffered_consts=False)(*args)

    # (BT, N, C) -> (B, C, T, H, W)
    return jnp.transpose(y.reshape(B, T, H, W, C), (0, 4, 1, 2, 3))


# ------------------------------ pure-JAX reference ---------------------------

def attn_block_reference(x, params):
    """Pure-JAX fp32 reference mirroring the PyTorch forward (for verification)."""
    B, C, T, H, W = x.shape
    N = H * W
    xk = jnp.transpose(x, (0, 2, 3, 4, 1)).reshape(B * T, N, C)

    Cg = C // NUM_GROUPS
    xg = xk.reshape(B * T, N, NUM_GROUPS, Cg)
    mean = jnp.mean(xg, axis=(1, 3), keepdims=True)
    var = jnp.mean((xg - mean) ** 2, axis=(1, 3), keepdims=True)
    hn = ((xg - mean) / jnp.sqrt(var + EPS)).reshape(B * T, N, C)
    hn = hn * params["gamma"].reshape(1, 1, C) + params["beta"].reshape(1, 1, C)

    def lin(h, w, b):
        return jnp.einsum("bnc,oc->bno", h, w.reshape(C, C)) + b.reshape(1, 1, C)

    q = lin(hn, params["wq"], params["bq"])
    k = lin(hn, params["wk"], params["bk"])
    v = lin(hn, params["wv"], params["bv"])
    logits = jnp.einsum("bnc,bmc->bnm", q, k) * (float(C) ** -0.5)
    p = jax.nn.softmax(logits, axis=-1)
    attn = jnp.einsum("bnm,bmc->bnc", p, v)
    out = lin(attn, params["wp"], params["bp"])
    y = xk + out
    return jnp.transpose(y.reshape(B, T, H, W, C), (0, 4, 1, 2, 3))


if __name__ == "__main__":
    B, C, T, H, W = 2, 64, 2, 8, 8   # C must be divisible by 32 (GroupNorm groups)
    key = jax.random.PRNGKey(0)
    keys = jax.random.split(key, 11)

    x = jax.random.normal(keys[0], (B, C, T, H, W), dtype=jnp.float32)

    params = {
        "gamma": 1.0 + 0.1 * jax.random.normal(keys[1], (C,), dtype=jnp.float32),
        "beta": 0.1 * jax.random.normal(keys[2], (C,), dtype=jnp.float32),
        "wq": 0.1 * jax.random.normal(keys[3], (C, C, 1, 1), dtype=jnp.float32),
        "bq": 0.1 * jax.random.normal(keys[4], (C,), dtype=jnp.float32),
        "wk": 0.1 * jax.random.normal(keys[5], (C, C, 1, 1), dtype=jnp.float32),
        "bk": 0.1 * jax.random.normal(keys[6], (C,), dtype=jnp.float32),
        "wv": 0.1 * jax.random.normal(keys[7], (C, C, 1, 1), dtype=jnp.float32),
        "bv": 0.1 * jax.random.normal(keys[8], (C,), dtype=jnp.float32),
        "wp": 0.1 * jax.random.normal(keys[9], (C, C, 1, 1), dtype=jnp.float32),
        "bp": 0.1 * jax.random.normal(keys[10], (C,), dtype=jnp.float32),
    }

    y = jax.block_until_ready(attn_block_forward(x, params))
    y_ref = jax.block_until_ready(attn_block_reference(x, params))

    assert y.shape == (B, C, T, H, W)
    # bf16 MXU operands + approx reciprocal -> intentionally looser tolerance than fp32
    np.testing.assert_allclose(np.asarray(y), np.asarray(y_ref), rtol=3e-2, atol=3e-2)

    print("KERNEL_OK")
</pallas_src>

<mosaic_0001>
module attributes {stable_mosaic.version = 11 : i64} {
  func.func @attn_block_kernel(%arg0: i32, %arg1: i32, %arg2: memref<2x64x64xf32, #tpu.memory_space<vmem>>, %arg3: memref<64x64xf32, #tpu.memory_space<vmem>>, %arg4: memref<64x64xbf16, #tpu.memory_space<vmem>>, %arg5: memref<1x64xf32, #tpu.memory_space<vmem>>, %arg6: memref<64x64xbf16, #tpu.memory_space<vmem>>, %arg7: memref<1x64xf32, #tpu.memory_space<vmem>>, %arg8: memref<64x64xbf16, #tpu.memory_space<vmem>>, %arg9: memref<1x64xf32, #tpu.memory_space<vmem>>, %arg10: memref<64x64xbf16, #tpu.memory_space<vmem>>, %arg11: memref<1x64xf32, #tpu.memory_space<vmem>>, %arg12: memref<2x64x64xf32, #tpu.memory_space<vmem>>, %arg13: memref<2x64x64xbf16, #tpu.memory_space<vmem>>, %arg14: memref<2x64x64xbf16, #tpu.memory_space<vmem>>, %arg15: memref<2x64x64xbf16, #tpu.memory_space<vmem>>) attributes {dimension_semantics = [#tpu.dimension_semantics<parallel>, #tpu.dimension_semantics<arbitrary>], iteration_bounds = array<i64: 2, 1>, scalar_prefetch = 0 : i64, scratch_operands = 3 : i64, tpu.core_type = #tpu.core_type<tc>, window_params = [{transform_indices = @transform_0, window_bounds = array<i64: 2, 64, 64>}, {pipeline_mode = #tpu.pipeline_mode<synchronous>, transform_indices = @transform_1, window_bounds = array<i64: 64, 64>}, {pipeline_mode = #tpu.pipeline_mode<synchronous>, transform_indices = @transform_2, window_bounds = array<i64: 64, 64>}, {pipeline_mode = #tpu.pipeline_mode<synchronous>, transform_indices = @transform_3, window_bounds = array<i64: 1, 64>}, {pipeline_mode = #tpu.pipeline_mode<synchronous>, transform_indices = @transform_4, window_bounds = array<i64: 64, 64>}, {pipeline_mode = #tpu.pipeline_mode<synchronous>, transform_indices = @transform_5, window_bounds = array<i64: 1, 64>}, {pipeline_mode = #tpu.pipeline_mode<synchronous>, transform_indices = @transform_6, window_bounds = array<i64: 64, 64>}, {pipeline_mode = #tpu.pipeline_mode<synchronous>, transform_indices = @transform_7, window_bounds = array<i64: 1, 64>}, {pipeline_mode = #tpu.pipeline_mode<synchronous>, transform_indices = @transform_8, window_bounds = array<i64: 64, 64>}, {pipeline_mode = #tpu.pipeline_mode<synchronous>, transform_indices = @transform_9, window_bounds = array<i64: 1, 64>}, {transform_indices = @transform_10, window_bounds = array<i64: 2, 64, 64>}]} {
    %c0_i32 = arith.constant 0 : i32
    %0 = arith.cmpi eq, %arg1, %c0_i32 : i32
    %1 = arith.extui %0 : i1 to i32
    %c0_i32_0 = arith.constant 0 : i32
    %2 = arith.cmpi ne, %1, %c0_i32_0 : i32
    scf.if %2 {
      %c0_21 = arith.constant 0 : index
      %c0_22 = arith.constant 0 : index
      %c0_23 = arith.constant 0 : index
      %34 = vector.load %arg2[%c0_21, %c0_22, %c0_23] : memref<2x64x64xf32, #tpu.memory_space<vmem>>, vector<2x64x64xf32>
      %cst_24 = arith.constant dense<0.000000e+00> : vector<2x64xf32>
      %35 = vector.multi_reduction <add>, %34, %cst_24 [1] : vector<2x64x64xf32> to vector<2x64xf32>
      %cst_25 = arith.constant 1.562500e-02 : f32
      %36 = vector.broadcast %cst_25 : f32 to vector<2x64xf32>
      %37 = arith.mulf %35, %36 : vector<2x64xf32>
      %38 = arith.mulf %34, %34 : vector<2x64x64xf32>
      %cst_26 = arith.constant dense<0.000000e+00> : vector<2x64xf32>
      %39 = vector.multi_reduction <add>, %38, %cst_26 [1] : vector<2x64x64xf32> to vector<2x64xf32>
      %cst_27 = arith.constant 1.562500e-02 : f32
      %40 = vector.broadcast %cst_27 : f32 to vector<2x64xf32>
      %41 = arith.mulf %39, %40 : vector<2x64xf32>
      %c0_28 = arith.constant 0 : index
      %c0_29 = arith.constant 0 : index
      %42 = vector.load %arg3[%c0_28, %c0_29] : memref<64x64xf32, #tpu.memory_space<vmem>>, vector<64x64xf32>
      %cst_30 = arith.constant dense<0.000000e+00> : vector<2x64xf32>
      %43 = tpu.matmul %37, %42, %cst_30 {dimension_numbers = #tpu.dot_dimension_numbers<[1], [0], [0], [1], [0, 0, 1, 1], [], []>} : vector<2x64xf32>, vector<64x64xf32>, vector<2x64xf32> -> vector<2x64xf32>
      %c0_31 = arith.constant 0 : index
      %c0_32 = arith.constant 0 : index
      %44 = vector.load %arg3[%c0_31, %c0_32] : memref<64x64xf32, #tpu.memory_space<vmem>>, vector<64x64xf32>
      %cst_33 = arith.constant dense<0.000000e+00> : vector<2x64xf32>
      %45 = tpu.matmul %41, %44, %cst_33 {dimension_numbers = #tpu.dot_dimension_numbers<[1], [0], [0], [1], [0, 0, 1, 1], [], []>} : vector<2x64xf32>, vector<64x64xf32>, vector<2x64xf32> -> vector<2x64xf32>
      %46 = arith.mulf %43, %43 : vector<2x64xf32>
      %47 = arith.subf %45, %46 : vector<2x64xf32>
      %cst_34 = arith.constant 0.000000e+00 : f32
      %48 = vector.broadcast %cst_34 : f32 to vector<2x64xf32>
      %49 = arith.maximumf %47, %48 : vector<2x64xf32>
      %cst_35 = arith.constant 9.99999997E-7 : f32
      %50 = vector.broadcast %cst_35 : f32 to vector<2x64xf32>
      %51 = arith.addf %49, %50 : vector<2x64xf32>
      %52 = math.rsqrt %51 : vector<2x64xf32>
      %53 = vector.shape_cast %43 : vector<2x64xf32> to vector<2x1x64xf32>
      %54 = vector.broadcast %53 : vector<2x1x64xf32> to vector<2x64x64xf32>
      %55 = arith.subf %34, %54 : vector<2x64x64xf32>
      %56 = vector.shape_cast %52 : vector<2x64xf32> to vector<2x1x64xf32>
      %57 = vector.broadcast %56 : vector<2x1x64xf32> to vector<2x64x64xf32>
      %58 = arith.mulf %55, %57 : vector<2x64x64xf32>
      %59 = arith.truncf %58 : vector<2x64x64xf32> to vector<2x64x64xbf16>
      %60 = vector.shape_cast %59 : vector<2x64x64xbf16> to vector<128x64xbf16>
      %c0_36 = arith.constant 0 : index
      %c0_37 = arith.constant 0 : index
      %61 = vector.load %arg4[%c0_36, %c0_37] : memref<64x64xbf16, #tpu.memory_space<vmem>>, vector<64x64xbf16>
      %cst_38 = arith.constant dense<0.000000e+00> : vector<128x64xf32>
      %62 = tpu.matmul %60, %61, %cst_38 {dimension_numbers = #tpu.dot_dimension_numbers<[1], [0], [0], [1], [0, 0, 1, 1], [], []>} : vector<128x64xbf16>, vector<64x64xbf16>, vector<128x64xf32> -> vector<128x64xf32>
      %c0_39 = arith.constant 0 : index
      %c0_40 = arith.constant 0 : index
      %63 = vector.load %arg5[%c0_39, %c0_40] : memref<1x64xf32, #tpu.memory_space<vmem>>, vector<1x64xf32>
      %64 = vector.broadcast %63 : vector<1x64xf32> to vector<128x64xf32>
      %65 = arith.addf %62, %64 : vector<128x64xf32>
      %66 = arith.truncf %65 : vector<128x64xf32> to vector<128x64xbf16>
      %67 = vector.shape_cast %66 : vector<128x64xbf16> to vector<2x64x64xbf16>
      %c0_41 = arith.constant 0 : index
      %c0_42 = arith.constant 0 : index
      %c0_43 = arith.constant 0 : index
      %68 = vector.load %arg13[%c0_41, %c0_42, %c0_43] : memref<2x64x64xbf16, #tpu.memory_space<vmem>>, vector<2x64x64xbf16>
      tpu.vector_store %arg13[%c0_41, %c0_42, %c0_43], %67 {strides = array<i32>} : memref<2x64x64xbf16, #tpu.memory_space<vmem>>, vector<2x64x64xbf16>,
      %c0_44 = arith.constant 0 : index
      %c0_45 = arith.constant 0 : index
      %69 = vector.load %arg6[%c0_44, %c0_45] : memref<64x64xbf16, #tpu.memory_space<vmem>>, vector<64x64xbf16>
      %cst_46 = arith.constant dense<0.000000e+00> : vector<128x64xf32>
      %70 = tpu.matmul %60, %69, %cst_46 {dimension_numbers = #tpu.dot_dimension_numbers<[1], [0], [0], [1], [0, 0, 1, 1], [], []>} : vector<128x64xbf16>, vector<64x64xbf16>, vector<128x64xf32> -> vector<128x64xf32>
      %c0_47 = arith.constant 0 : index
      %c0_48 = arith.constant 0 : index
      %71 = vector.load %arg7[%c0_47, %c0_48] : memref<1x64xf32, #tpu.memory_space<vmem>>, vector<1x64xf32>
      %72 = vector.broadcast %71 : vector<1x64xf32> to vector<128x64xf32>
      %73 = arith.addf %70, %72 : vector<128x64xf32>
      %74 = arith.truncf %73 : vector<128x64xf32> to vector<128x64xbf16>
      %75 = vector.shape_cast %74 : vector<128x64xbf16> to vector<2x64x64xbf16>
      %c0_49 = arith.constant 0 : index
      %c0_50 = arith.constant 0 : index
      %c0_51 = arith.constant 0 : index
      %76 = vector.load %arg14[%c0_49, %c0_50, %c0_51] : memref<2x64x64xbf16, #tpu.memory_space<vmem>>, vector<2x64x64xbf16>
      tpu.vector_store %arg14[%c0_49, %c0_50, %c0_51], %75 {strides = array<i32>} : memref<2x64x64xbf16, #tpu.memory_space<vmem>>, vector<2x64x64xbf16>,
      %c0_52 = arith.constant 0 : index
      %c0_53 = arith.constant 0 : index
      %77 = vector.load %arg8[%c0_52, %c0_53] : memref<64x64xbf16, #tpu.memory_space<vmem>>, vector<64x64xbf16>
      %cst_54 = arith.constant dense<0.000000e+00> : vector<128x64xf32>
      %78 = tpu.matmul %60, %77, %cst_54 {dimension_numbers = #tpu.dot_dimension_numbers<[1], [0], [0], [1], [0, 0, 1, 1], [], []>} : vector<128x64xbf16>, vector<64x64xbf16>, vector<128x64xf32> -> vector<128x64xf32>
      %c0_55 = arith.constant 0 : index
      %c0_56 = arith.constant 0 : index
      %79 = vector.load %arg9[%c0_55, %c0_56] : memref<1x64xf32, #tpu.memory_space<vmem>>, vector<1x64xf32>
      %80 = vector.broadcast %79 : vector<1x64xf32> to vector<128x64xf32>
      %81 = arith.addf %78, %80 : vector<128x64xf32>
      %82 = arith.truncf %81 : vector<128x64xf32> to vector<128x64xbf16>
      %83 = vector.shape_cast %82 : vector<128x64xbf16> to vector<2x64x64xbf16>
      %c0_57 = arith.constant 0 : index
      %c0_58 = arith.constant 0 : index
      %c0_59 = arith.constant 0 : index
      %84 = vector.load %arg15[%c0_57, %c0_58, %c0_59] : memref<2x64x64xbf16, #tpu.memory_space<vmem>>, vector<2x64x64xbf16>
      tpu.vector_store %arg15[%c0_57, %c0_58, %c0_59], %83 {strides = array<i32>} : memref<2x64x64xbf16, #tpu.memory_space<vmem>>, vector<2x64x64xbf16>,
    } else {
    }
    %c64_i32 = arith.constant 64 : i32
    %3 = arith.muli %arg1, %c64_i32 : i32
    %4 = tpu.assume_multiple %3, 64 : i32
    %c0 = arith.constant 0 : index
    %5 = arith.index_cast %4 : i32 to index
    %c0_1 = arith.constant 0 : index
    %6 = vector.load %arg13[%c0, %5, %c0_1] : memref<2x64x64xbf16, #tpu.memory_space<vmem>>, vector<2x64x64xbf16>
    %c0_2 = arith.constant 0 : index
    %c0_3 = arith.constant 0 : index
    %c0_4 = arith.constant 0 : index
    %7 = vector.load %arg14[%c0_2, %c0_3, %c0_4] : memref<2x64x64xbf16, #tpu.memory_space<vmem>>, vector<2x64x64xbf16>
    "tpu.trace_start"() <{level = 10 : i32, message = "bnc,bmc->bnm"}> : () -> ()
    %cst = arith.constant dense<0.000000e+00> : vector<2x64x64xf32>
    %8 = tpu.matmul %6, %7, %cst {dimension_numbers = #tpu.dot_dimension_numbers<[2], [2], [1], [1], [0, 0, 0, 1, 1, 1], [0], [0]>} : vector<2x64x64xbf16>, vector<2x64x64xbf16>, vector<2x64x64xf32> -> vector<2x64x64xf32>
    "tpu.trace_stop"() : () -> ()
    %cst_5 = arith.constant dense<0xFF800000> : vector<2x64xf32>
    %9 = vector.multi_reduction <maximumf>, %8, %cst_5 [2] : vector<2x64x64xf32> to vector<2x64xf32>
    %10 = vector.shape_cast %9 : vector<2x64xf32> to vector<2x64x1xf32>
    %11 = vector.broadcast %10 : vector<2x64x1xf32> to vector<2x64x64xf32>
    %12 = arith.subf %8, %11 : vector<2x64x64xf32>
    %13 = math.exp %12 : vector<2x64x64xf32>
    %cst_6 = arith.constant dense<0.000000e+00> : vector<2x64xf32>
    %14 = vector.multi_reduction <add>, %13, %cst_6 [2] : vector<2x64x64xf32> to vector<2x64xf32>
    %15 = vector.shape_cast %14 : vector<2x64xf32> to vector<2x64x1xf32>
    %16 = arith.truncf %13 : vector<2x64x64xf32> to vector<2x64x64xbf16>
    %c0_7 = arith.constant 0 : index
    %c0_8 = arith.constant 0 : index
    %c0_9 = arith.constant 0 : index
    %17 = vector.load %arg15[%c0_7, %c0_8, %c0_9] : memref<2x64x64xbf16, #tpu.memory_space<vmem>>, vector<2x64x64xbf16>
    "tpu.trace_start"() <{level = 10 : i32, message = "bnm,bmc->bnc"}> : () -> ()
    %cst_10 = arith.constant dense<0.000000e+00> : vector<2x64x64xf32>
    %18 = tpu.matmul %16, %17, %cst_10 {dimension_numbers = #tpu.dot_dimension_numbers<[2], [1], [1], [2], [0, 0, 0, 1, 1, 2], [0], [0]>} : vector<2x64x64xbf16>, vector<2x64x64xbf16>, vector<2x64x64xf32> -> vector<2x64x64xf32>
    "tpu.trace_stop"() : () -> ()
    %19 = tpu.reciprocal %15 {approx = true} : vector<2x64x1xf32> -> vector<2x64x1xf32>
    %20 = vector.broadcast %19 : vector<2x64x1xf32> to vector<2x64x64xf32>
    %21 = arith.mulf %18, %20 : vector<2x64x64xf32>
    %22 = vector.shape_cast %21 : vector<2x64x64xf32> to vector<128x64xf32>
    %23 = arith.truncf %22 : vector<128x64xf32> to vector<128x64xbf16>
    %c0_11 = arith.constant 0 : index
    %c0_12 = arith.constant 0 : index
    %24 = vector.load %arg10[%c0_11, %c0_12] : memref<64x64xbf16, #tpu.memory_space<vmem>>, vector<64x64xbf16>
    %cst_13 = arith.constant dense<0.000000e+00> : vector<128x64xf32>
    %25 = tpu.matmul %23, %24, %cst_13 {dimension_numbers = #tpu.dot_dimension_numbers<[1], [0], [0], [1], [0, 0, 1, 1], [], []>} : vector<128x64xbf16>, vector<64x64xbf16>, vector<128x64xf32> -> vector<128x64xf32>
    %c0_14 = arith.constant 0 : index
    %c0_15 = arith.constant 0 : index
    %26 = vector.load %arg11[%c0_14, %c0_15] : memref<1x64xf32, #tpu.memory_space<vmem>>, vector<1x64xf32>
    %27 = vector.broadcast %26 : vector<1x64xf32> to vector<128x64xf32>
    %28 = arith.addf %25, %27 : vector<128x64xf32>
    %c0_16 = arith.constant 0 : index
    %29 = arith.index_cast %4 : i32 to index
    %c0_17 = arith.constant 0 : index
    %30 = vector.load %arg2[%c0_16, %29, %c0_17] : memref<2x64x64xf32, #tpu.memory_space<vmem>>, vector<2x64x64xf32>
    %31 = vector.shape_cast %28 : vector<128x64xf32> to vector<2x64x64xf32>
    %32 = arith.addf %30, %31 : vector<2x64x64xf32>
    %c0_18 = arith.constant 0 : index
    %c0_19 = arith.constant 0 : index
    %c0_20 = arith.constant 0 : index
    %33 = vector.load %arg12[%c0_18, %c0_19, %c0_20] : memref<2x64x64xf32, #tpu.memory_space<vmem>>, vector<2x64x64xf32>
    tpu.vector_store %arg12[%c0_18, %c0_19, %c0_20], %32 {strides = array<i32>} : memref<2x64x64xf32, #tpu.memory_space<vmem>>, vector<2x64x64xf32>,
    return
  }
  func.func @transform_0(%arg0: i32, %arg1: i32) -> (i32, i32, i32) {
    %c0_i32 = arith.constant 0 : i32
    %c0_i32_0 = arith.constant 0 : i32
    %c0_i32_1 = arith.constant 0 : i32
    return %arg0, %c0_i32, %c0_i32_0 : i32, i32, i32
  }
  func.func @transform_1(%arg0: i32, %arg1: i32) -> (i32, i32) {
    %c0_i32 = arith.constant 0 : i32
    %c0_i32_0 = arith.constant 0 : i32
    %c0_i32_1 = arith.constant 0 : i32
    return %c0_i32, %c0_i32_0 : i32, i32
  }
  func.func @transform_2(%arg0: i32, %arg1: i32) -> (i32, i32) {
    %c0_i32 = arith.constant 0 : i32
    %c0_i32_0 = arith.constant 0 : i32
    %c0_i32_1 = arith.constant 0 : i32
    return %c0_i32, %c0_i32_0 : i32, i32
  }
  func.func @transform_3(%arg0: i32, %arg1: i32) -> (i32, i32) {
    %c0_i32 = arith.constant 0 : i32
    %c0_i32_0 = arith.constant 0 : i32
    %c0_i32_1 = arith.constant 0 : i32
    return %c0_i32, %c0_i32_0 : i32, i32
  }
  func.func @transform_4(%arg0: i32, %arg1: i32) -> (i32, i32) {
    %c0_i32 = arith.constant 0 : i32
    %c0_i32_0 = arith.constant 0 : i32
    %c0_i32_1 = arith.constant 0 : i32
    return %c0_i32, %c0_i32_0 : i32, i32
  }
  func.func @transform_5(%arg0: i32, %arg1: i32) -> (i32, i32) {
    %c0_i32 = arith.constant 0 : i32
    %c0_i32_0 = arith.constant 0 : i32
    %c0_i32_1 = arith.constant 0 : i32
    return %c0_i32, %c0_i32_0 : i32, i32
  }
  func.func @transform_6(%arg0: i32, %arg1: i32) -> (i32, i32) {
    %c0_i32 = arith.constant 0 : i32
    %c0_i32_0 = arith.constant 0 : i32
    %c0_i32_1 = arith.constant 0 : i32
    return %c0_i32, %c0_i32_0 : i32, i32
  }
  func.func @transform_7(%arg0: i32, %arg1: i32) -> (i32, i32) {
    %c0_i32 = arith.constant 0 : i32
    %c0_i32_0 = arith.constant 0 : i32
    %c0_i32_1 = arith.constant 0 : i32
    return %c0_i32, %c0_i32_0 : i32, i32
  }
  func.func @transform_8(%arg0: i32, %arg1: i32) -> (i32, i32) {
    %c0_i32 = arith.constant 0 : i32
    %c0_i32_0 = arith.constant 0 : i32
    %c0_i32_1 = arith.constant 0 : i32
    return %c0_i32, %c0_i32_0 : i32, i32
  }
  func.func @transform_9(%arg0: i32, %arg1: i32) -> (i32, i32) {
    %c0_i32 = arith.constant 0 : i32
    %c0_i32_0 = arith.constant 0 : i32
    %c0_i32_1 = arith.constant 0 : i32
    return %c0_i32, %c0_i32_0 : i32, i32
  }
  func.func @transform_10(%arg0: i32, %arg1: i32) -> (i32, i32, i32) {
    %c0_i32 = arith.constant 0 : i32
    %c0_i32_0 = arith.constant 0 : i32
    return %arg0, %arg1, %c0_i32 : i32, i32, i32
  }
}

</mosaic_0001>

<bundles_post_ra>
// kernel: tpu_custom_call.1
= control target key start
LH: loop header
LB: loop body
LE: loop exit
PB: predicated region body
PF: predicated region fallthrough
CT: control target
= control target key end

     0   :  { %s4387_s0 = inlined_call_operand.hbm [shape: f32[4,64,64], index: 0, kind: input, shape index: {}]   ;;  %s4388_s1 = inlined_call_operand.hbm [shape: f32[64,64], index: 1, kind: input, shape index: {}]   ;;  %s4389_s2 = inlined_call_operand.hbm [shape: bf16[64,64], index: 2, kind: input, shape index: {}]   ;;  %s4390_s3 = inlined_call_operand.hbm [shape: f32[1,64], index: 3, kind: input, shape index: {}]   ;;  %s4391_s4 = inlined_call_operand.hbm [shape: bf16[64,64], index: 4, kind: input, shape index: {}]   ;;  %s4392_s5 = inlined_call_operand.hbm [shape: f32[1,64], index: 5, kind: input, shape index: {}]   ;;  %s4393_s6 = inlined_call_operand.hbm [shape: bf16[64,64], index: 6, kind: input, shape index: {}]   ;;  %s4394_s7 = inlined_call_operand.hbm [shape: f32[1,64], index: 7, kind: input, shape index: {}]   ;;  %s4395_s8 = inlined_call_operand.hbm [shape: bf16[64,64], index: 8, kind: input, shape index: {}]   ;;  %s4396_s9 = inlined_call_operand.hbm [shape: f32[1,64], index: 9, kind: input, shape index: {}]   ;;  %s4397_s10 = inlined_call_operand.hbm [shape: f32[4,64,64], index: 10, kind: output, shape index: {}]  }
   0x1   :  { %4408 = sst [smem:[#allocation32_spill]] %s4387_s0 }
   0x2   :  { %4409 = sst [smem:[#allocation33_spill]] %s4388_s1 }
   0x3   :  { %4410 = sst [smem:[#allocation34_spill]] %s4390_s3 }
   0x4   :  { %4411 = sst [smem:[#allocation35_spill]] %s4397_s10 }
   0x5   :  { %15 = vsyncpa [#allocation6], 0 }
   0x6   :  { %17 = vsyncpa [#allocation6 + $0x1], 0 }
   0x7   :  { %18 = vsyncpa [#allocation9], 0 }
   0x8   :  { %19 = vsyncpa [#allocation12], 0 }
   0x9   :  { %20 = vsyncpa [#allocation15], 0 }
   0xa   :  { %21 = vsyncpa [#allocation18], 0 }
   0xb   :  { %22 = vsyncpa [#allocation21], 0 }
   0xc   :  { %23 = vsyncpa [#allocation7], 0 }
   0xd   :  { %25 = vsyncpa [#allocation7 + $0x1], 0  ;;  %s3493_s13 = smov 0   ;;  %s3495_s14 = smov 0  }
   0xe   :  { %s3497_s15 = smov 0   ;;  %s3499_s16 = smov 0  }
   0xf   :  { %s3501_s17 = smov 0   ;;  %s3503_s18 = smov 0  }
  0x10 LB: > { %4412 = sst [smem:[#allocation30_spill]] %s3407_s16  ;;  %s4398_s19 = sadd.s32 4294967295, %s3415_s18   ;;  %s3415_s18 = sphi %s3503_s18, %s31_s18   ;;  %s3411_s17 = sphi %s3501_s17, %s4442_s17   ;;  %s3407_s16 = sphi %s3499_s16, %s4441_s16   ;;  %s3403_s15 = sphi %s3497_s15, %s4440_s15   ;;  %s3399_s14 = sphi %s3495_s14, %s4439_s14   ;;  %s3395_s13 = sphi %s3493_s13, %s4438_s13  }
  0x11   : > { %p2351_p0 = scmp.ge.s32.totalorder %s3415_s18, 1  ;;  %p3527_p1 = scmp.eq.s32.totalorder %s4398_s19, 0 }
  0x12   : > { %p291_p2 = scmp.lt.s32.totalorder %s3415_s18, 3  ;;  %s3417_s22 = smov [#allocation8]  }
  0x13   : > { %s4413_s20 = scalar_select %p3527_p1, 1, 0 }
  0x14   : > { %p3532_p3 = pnand %p2351_p0, %p291_p2  ;;  %s303_s23 = sshll.u32 %s3417_s22, 4  ;;  %s3536_s23 = int_to_ptr.vmem [resolvable:$true] %s303_s23 }
  0x15   : > { %s3418_s25 = smov [#allocation11]   ;;  %s3419_s27 = smov [#allocation14]  }
  0x16   : > { %s4414_s21 = scalar_select %p3532_p3, 1, 0 }
  0x17   : > { %p2826_p4 = pneg %p3532_p3  ;;  %s330_s26 = sshll.u32 %s3418_s25, 4  ;;  %s3547_s26 = int_to_ptr.vmem [resolvable:$true] %s330_s26 }
  0x18   : > { %4415 = sst [smem:[#allocation31_spill]] %s4414_s21  ;;  %s3549_s28 = sshll.u32 %s3419_s27, 4  ;;  %s355_s28 = int_to_ptr.vmem [resolvable:$true] %s3549_s28 }
  0x19   : > { %p3543_p6 = pnand %p2826_p4, %p3527_p1  ;;  %s4417_s1 = sld [smem:[#allocation33_spill]] }
  0x1b   : > { %p3559_p8 = pneg %p3543_p6 }
  0x1f   : > { %s3031_s11 = scalar_lea.hbm %s4417_s1, 1024 }
  0x20   : > { %p3032_p7 = scmp.ne.s32.totalorder %s4417_s1, %s3031_s11  ;;  %p3038_p11 = scmp.lt.u32.totalorder %s3031_s11, %s4417_s1 }
  0x22   : > { %p3034_p9 = pnand %p3559_p8, %p3032_p7 }
  0x24   : > { %p3035_p10 = pneg %p3034_p9 }
  0x26   : > { %p3040_p12 = pnand %p3038_p11, %p3035_p10 }
  0x28   : > { %3043 = shalt.err (!%p3040_p12)
}
  0x29   : > { %s3044_s29 = scalar_lea.vmem %s3536_s23, 1024  ;;  %p3052_p4 = scmp.lt.s32.totalorder %s3536_s23, %s3536_s23 }
  0x2a   : > { %p3045_p13 = scmp.ne.s32.totalorder %s3536_s23, %s3044_s29  ;;  %p3053_p5 = scmp.lt.s32.totalorder %s3044_s29, %s3044_s29 }
  0x2c   : > { %p3047_p0 = pnand %p3045_p13, %p3559_p8  ;;  %p3054_p7 = por %p3053_p5, %p3052_p4 }
  0x2e   : > { %p3048_p2 = pneg %p3047_p0 }
  0x30   : > { %p3055_p9 = pnand %p3054_p7, %p3048_p2 }
  0x32   : > { %3058 = shalt.err (!%p3055_p9)
}
  0x33   : > { %s4405_s30 = smov 128   ;;  %s4406_s11 = smov 8  }
  0x34   : > { %2829 = dma.hbm_to_vmem [thread:$0]  (!%p3543_p6), %s4417_s1, 1024, %s3536_s23, [#allocation9], %s4405_s30, %s4405_s30, %s4406_s11  }
  0x35   : > { %s4419_s3 = sld [smem:[#allocation34_spill]] }
  0x3b   : > { %s3059_s29 = scalar_lea.hbm %s4419_s3, 16 }
  0x3c   : > { %p3060_p5 = scmp.ne.s32.totalorder %s4419_s3, %s3059_s29  ;;  %p3066_p12 = scmp.lt.u32.totalorder %s3059_s29, %s4419_s3 }
  0x3e   : > { %p3062_p10 = pnand %p3060_p5, %p3559_p8 }
  0x40   : > { %p3063_p11 = pneg %p3062_p10 }
  0x42   : > { %p3068_p13 = pnand %p3066_p12, %p3063_p11 }
  0x44   : > { %3071 = shalt.err (!%p3068_p13)
}
  0x45   : > { %s3072_s23 = scalar_lea.vmem %s3547_s26, 16  ;;  %s3079_s10 = scalar_lea.vmem %s3547_s26, 32 }
  0x46   : > { %p3073_p0 = scmp.ne.s32.totalorder %s3547_s26, %s3072_s23  ;;  %p3080_p7 = scmp.lt.s32.totalorder %s3547_s26, %s3547_s26 }
  0x47   : > { %p3081_p9 = scmp.lt.s32.totalorder %s3079_s10, %s3072_s23 }
  0x48   : > { %p3075_p2 = pnand %p3073_p0, %p3559_p8 }
  0x49   : > { %p3082_p5 = por %p3081_p9, %p3080_p7 }
  0x4a   : > { %p3076_p4 = pneg %p3075_p2 }
  0x4c   : > { %p3083_p10 = pnand %p3082_p5, %p3076_p4 }
  0x4e   : > { %3086 = shalt.err (!%p3083_p10)
}
  0x4f   : > { %2835 = dma.hbm_to_vmem [thread:$0]  (!%p3543_p6), %s4419_s3, 16, %s3547_s26, [#allocation12]  }
  0x50   : > { %s3087_s22 = scalar_lea.hbm %s4392_s5, 16 }
  0x51   : > { %p3088_p11 = scmp.ne.s32.totalorder %s4392_s5, %s3087_s22  ;;  %p3094_p0 = scmp.lt.u32.totalorder %s3087_s22, %s4392_s5 }
  0x53   : > { %p3090_p12 = pnand %p3088_p11, %p3559_p8 }
  0x55   : > { %p3091_p13 = pneg %p3090_p12 }
  0x57   : > { %p3096_p2 = pnand %p3094_p0, %p3091_p13 }
  0x59   : > { %3099 = shalt.err (!%p3096_p2)
}
  0x5a   : > { %s3100_s10 = scalar_lea.vmem %s355_s28, 16  ;;  %s3107_s26 = scalar_lea.vmem %s355_s28, 32 }
  0x5b   : > { %p3101_p4 = scmp.ne.s32.totalorder %s355_s28, %s3100_s10  ;;  %p3108_p5 = scmp.lt.s32.totalorder %s355_s28, %s355_s28 }
  0x5c   : > { %p3109_p10 = scmp.lt.s32.totalorder %s3107_s26, %s3100_s10 }
  0x5d   : > { %p3103_p7 = pnand %p3101_p4, %p3559_p8 }
  0x5e   : > { %p3110_p3 = por %p3109_p10, %p3108_p5 }
  0x5f   : > { %p3104_p9 = pneg %p3103_p7 }
  0x61   : > { %p3111_p1 = pnand %p3110_p3, %p3104_p9 }
  0x63   : > { %3114 = shalt.err (!%p3111_p1)
}
  0x64   : > { %2841 = dma.hbm_to_vmem [thread:$0]  (!%p3543_p6), %s4392_s5, 16, %s355_s28, [#allocation15]  }
  0x65   : > { %s3422_s21 = smov [#allocation17]   ;;  %s3423_s22 = smov [#allocation10]  }
  0x66   : > { %s378_s12 = sshll.u32 %s3422_s21, 4  ;;  %s316_s25 = sshll.u32 %s3423_s22, 4  ;;  %s379_s12 = int_to_ptr.vmem [resolvable:$true] %s378_s12  ;;  %s317_s25 = int_to_ptr.vmem [resolvable:$true] %s316_s25 }
  0x67   : > { %s3115_s23 = scalar_lea.hbm %s4394_s7, 16 }
  0x68   : > { %p3116_p1 = scmp.ne.s32.totalorder %s4394_s7, %s3115_s23  ;;  %p3122_p12 = scmp.lt.u32.totalorder %s3115_s23, %s4394_s7 }
  0x6a   : > { %p3118_p3 = pnand %p3116_p1, %p3559_p8 }
  0x6c   : > { %p3119_p11 = pneg %p3118_p3 }
  0x6e   : > { %p3124_p13 = pnand %p3122_p12, %p3119_p11 }
  0x70   : > { %3127 = shalt.err (!%p3124_p13)
}
  0x71   : > { %s3128_s28 = scalar_lea.vmem %s379_s12, 16  ;;  %s3135_s16 = scalar_lea.vmem %s379_s12, 32 }
  0x72   : > { %p3129_p0 = scmp.ne.s32.totalorder %s379_s12, %s3128_s28  ;;  %p3136_p7 = scmp.lt.s32.totalorder %s379_s12, %s379_s12 }
  0x73   : > { %p3137_p9 = scmp.lt.s32.totalorder %s3135_s16, %s3128_s28 }
  0x74   : > { %p3131_p2 = pnand %p3129_p0, %p3559_p8 }
  0x75   : > { %p3138_p5 = por %p3137_p9, %p3136_p7 }
  0x76   : > { %p3132_p4 = pneg %p3131_p2 }
  0x78   : > { %p3139_p10 = pnand %p3138_p5, %p3132_p4 }
  0x7a   : > { %3142 = shalt.err (!%p3139_p10)
}
  0x7b   : > { %2847 = dma.hbm_to_vmem [thread:$0]  (!%p3543_p6), %s4394_s7, 16, %s379_s12, [#allocation18]  }
  0x7c   : > { %s3143_s29 = scalar_lea.hbm %s4389_s2, 512 }
  0x7d   : > { %p3144_p1 = scmp.ne.s32.totalorder %s4389_s2, %s3143_s29  ;;  %p3150_p12 = scmp.lt.u32.totalorder %s3143_s29, %s4389_s2 }
  0x7f   : > { %p3146_p3 = pnand %p3144_p1, %p3559_p8 }
  0x81   : > { %p3147_p11 = pneg %p3146_p3 }
  0x83   : > { %p3152_p13 = pnand %p3150_p12, %p3147_p11 }
  0x85   : > { %3155 = shalt.err (!%p3152_p13)
}
  0x86   : > { %s3156_s28 = scalar_lea.vmem %s317_s25, 512  ;;  %p3164_p7 = scmp.lt.s32.totalorder %s317_s25, %s317_s25 }
  0x87   : > { %p3157_p0 = scmp.ne.s32.totalorder %s317_s25, %s3156_s28  ;;  %p3165_p9 = scmp.lt.s32.totalorder %s3156_s28, %s3156_s28 }
  0x89   : > { %p3159_p2 = pnand %p3157_p0, %p3559_p8  ;;  %p3166_p5 = por %p3165_p9, %p3164_p7 }
  0x8b   : > { %p3160_p4 = pneg %p3159_p2 }
  0x8d   : > { %p3167_p10 = pnand %p3166_p5, %p3160_p4 }
  0x8f   : > { %3170 = shalt.err (!%p3167_p10)
}
  0x90   : > { %s3424_s12 = smov 64   ;;  %s3425_s16 = smov 4  }
  0x91   : > { %2832 = dma.hbm_to_vmem [thread:$0]  (!%p3543_p6), %s4389_s2, 512, %s317_s25, [#allocation9], %s3424_s12, %s3424_s12, %s3425_s16  }
  0x92   : > { %s3426_s30 = smov [#allocation13]   ;;  %s3427_s29 = smov [#allocation16]  }
  0x93   : > { %s340_s27 = sshll.u32 %s3426_s30, 4  ;;  %s364_s23 = sshll.u32 %s3427_s29, 4  ;;  %s341_s27 = int_to_ptr.vmem [resolvable:$true] %s340_s27  ;;  %s365_s23 = int_to_ptr.vmem [resolvable:$true] %s364_s23 }
  0x94   : > { %s3171_s0 = scalar_lea.hbm %s4391_s4, 512 }
  0x95   : > { %p3172_p1 = scmp.ne.s32.totalorder %s4391_s4, %s3171_s0  ;;  %p3178_p12 = scmp.lt.u32.totalorder %s3171_s0, %s4391_s4 }
  0x97   : > { %p3174_p3 = pnand %p3172_p1, %p3559_p8 }
  0x99   : > { %p3175_p11 = pneg %p3174_p3 }
  0x9b   : > { %p3180_p13 = pnand %p3178_p12, %p3175_p11 }
  0x9d   : > { %3183 = shalt.err (!%p3180_p13)
}
  0x9e   : > { %s3184_s25 = scalar_lea.vmem %s341_s27, 512  ;;  %p3192_p7 = scmp.lt.s32.totalorder %s341_s27, %s341_s27 }
  0x9f   : > { %p3185_p0 = scmp.ne.s32.totalorder %s341_s27, %s3184_s25  ;;  %p3193_p9 = scmp.lt.s32.totalorder %s3184_s25, %s3184_s25 }
  0xa1   : > { %p3187_p2 = pnand %p3185_p0, %p3559_p8  ;;  %p3194_p5 = por %p3193_p9, %p3192_p7 }
  0xa3   : > { %p3188_p4 = pneg %p3187_p2 }
  0xa5   : > { %p3195_p10 = pnand %p3194_p5, %p3188_p4 }
  0xa7   : > { %3198 = shalt.err (!%p3195_p10)
}
  0xa8   : > { %2838 = dma.hbm_to_vmem [thread:$0]  (!%p3543_p6), %s4391_s4, 512, %s341_s27, [#allocation12], %s3424_s12, %s3424_s12, %s3425_s16  }
  0xa9   : > { %s3199_s22 = scalar_lea.hbm %s4393_s6, 512 }
  0xaa   : > { %p3200_p1 = scmp.ne.s32.totalorder %s4393_s6, %s3199_s22  ;;  %p3206_p12 = scmp.lt.u32.totalorder %s3199_s22, %s4393_s6 }
  0xac   : > { %p3202_p3 = pnand %p3200_p1, %p3559_p8 }
  0xae   : > { %p3203_p11 = pneg %p3202_p3 }
  0xb0   : > { %p3208_p13 = pnand %p3206_p12, %p3203_p11 }
  0xb2   : > { %3211 = shalt.err (!%p3208_p13)
}
  0xb3   : > { %s3212_s0 = scalar_lea.vmem %s365_s23, 512  ;;  %p3220_p7 = scmp.lt.s32.totalorder %s365_s23, %s365_s23 }
  0xb4   : > { %p3213_p0 = scmp.ne.s32.totalorder %s365_s23, %s3212_s0  ;;  %p3221_p9 = scmp.lt.s32.totalorder %s3212_s0, %s3212_s0 }
  0xb6   : > { %p3215_p2 = pnand %p3213_p0, %p3559_p8  ;;  %p3222_p5 = por %p3221_p9, %p3220_p7 }
  0xb8   : > { %p3216_p4 = pneg %p3215_p2 }
  0xba   : > { %p3223_p10 = pnand %p3222_p5, %p3216_p4 }
  0xbc   : > { %3226 = shalt.err (!%p3223_p10)
}
  0xbd   : > { %2844 = dma.hbm_to_vmem [thread:$0]  (!%p3543_p6), %s4393_s6, 512, %s365_s23, [#allocation15], %s3424_s12, %s3424_s12, %s3425_s16  }
  0xbe   : > { %s3428_s25 = smov [#allocation19]   ;;  %s3429_s3 = smov [#allocation20]  }
  0xbf   : > { %s388_s1 = sshll.u32 %s3428_s25, 4  ;;  %s402_s11 = sshll.u32 %s3429_s3, 4  ;;  %s389_s1 = int_to_ptr.vmem [resolvable:$true] %s388_s1  ;;  %s403_s11 = int_to_ptr.vmem [resolvable:$true] %s402_s11 }
  0xc0   : > { %s3227_s30 = scalar_lea.hbm %s4395_s8, 512 }
  0xc1   : > { %p3228_p1 = scmp.ne.s32.totalorder %s4395_s8, %s3227_s30  ;;  %p3234_p12 = scmp.lt.u32.totalorder %s3227_s30, %s4395_s8 }
  0xc3   : > { %p3230_p3 = pnand %p3228_p1, %p3559_p8 }
  0xc5   : > { %p3231_p11 = pneg %p3230_p3 }
  0xc7   : > { %p3236_p13 = pnand %p3234_p12, %p3231_p11 }
  0xc9   : > { %3239 = shalt.err (!%p3236_p13)
}
  0xca   : > { %s3240_s23 = scalar_lea.vmem %s389_s1, 512  ;;  %p3248_p7 = scmp.lt.s32.totalorder %s389_s1, %s389_s1 }
  0xcb   : > { %p3241_p0 = scmp.ne.s32.totalorder %s389_s1, %s3240_s23  ;;  %p3249_p9 = scmp.lt.s32.totalorder %s3240_s23, %s3240_s23 }
  0xcd   : > { %p3243_p2 = pnand %p3241_p0, %p3559_p8  ;;  %p3250_p5 = por %p3249_p9, %p3248_p7 }
  0xcf   : > { %p3244_p4 = pneg %p3243_p2 }
  0xd1   : > { %p3251_p10 = pnand %p3250_p5, %p3244_p4 }
  0xd3   : > { %3254 = shalt.err (!%p3251_p10)
}
  0xd4   : > { %2850 = dma.hbm_to_vmem [thread:$0]  (!%p3543_p6), %s4395_s8, 512, %s389_s1, [#allocation18], %s3424_s12, %s3424_s12, %s3425_s16  }
  0xd5   : > { %s3255_s21 = scalar_lea.hbm %s4396_s9, 16 }
  0xd6   : > { %p3256_p1 = scmp.ne.s32.totalorder %s4396_s9, %s3255_s21  ;;  %p3262_p12 = scmp.lt.u32.totalorder %s3255_s21, %s4396_s9 }
  0xd8   : > { %p3258_p3 = pnand %p3256_p1, %p3559_p8 }
  0xda   : > { %p3259_p11 = pneg %p3258_p3 }
  0xdc   : > { %p3264_p13 = pnand %p3262_p12, %p3259_p11 }
  0xde   : > { %3267 = shalt.err (!%p3264_p13)
}
  0xdf   : > { %s3268_s26 = scalar_lea.vmem %s403_s11, 16  ;;  %s3275_s12 = scalar_lea.vmem %s403_s11, 32 }
  0xe0   : > { %p3269_p0 = scmp.ne.s32.totalorder %s403_s11, %s3268_s26  ;;  %p3276_p7 = scmp.lt.s32.totalorder %s403_s11, %s403_s11 }
  0xe1   : > { %p3277_p9 = scmp.lt.s32.totalorder %s3275_s12, %s3268_s26 }
  0xe2   : > { %p3271_p2 = pnand %p3269_p0, %p3559_p8 }
  0xe3   : > { %p3278_p5 = por %p3277_p9, %p3276_p7 }
  0xe4   : > { %p3272_p4 = pneg %p3271_p2 }
  0xe6   : > { %p3279_p10 = pnand %p3278_p5, %p3272_p4 }
  0xe8   : > { %3282 = shalt.err (!%p3279_p10)
}
  0xe9   : > { %2853 = dma.hbm_to_vmem [thread:$0]  (!%p3543_p6), %s4396_s9, 16, %s403_s11, [#allocation21]  }
  0xea   : > { %s2350_s19 = sadd.s32 4294967294, %s3415_s18   ;;  %s43_s0 = sadd.s32 1, %s3411_s17 }
  0xeb   : > { %s50_s24 = sadd.s32 1, %s3403_s15  ;;  %p45_p8 = scmp.ge.s32.totalorder %s43_s0, 2 }
  0xec   : > { %p57_p1 = scmp.ne.s32.totalorder %s3403_s15, %s3399_s14  ;;  %p58_p3 = scmp.eq.s32.totalorder %s3415_s18, 0 }
  0xed   : > { %p63_p11 = scmp.ne.s32.totalorder %s3399_s14, %s3395_s13  ;;  %s4444_s0 = smov (%p45_p8, %s43_s0), 0 }
  0xee   : > { %p3756_p12 = por %p58_p3, %p57_p1  ;;  %p4421_p13 = scmp.ne.s32.totalorder %s4413_s20, 0 }
  0xef   : > { %s47_s27 = ssub.s32 %s3411_s17, %s4444_s0  ;;  %s4423_s28 = sadd.s32 4294967295, %s3415_s18  }
  0xf0   : > { %p3762_p6 = por %p4421_p13, %p63_p11  ;;  %p278_p0 = scmp.eq.s32.totalorder %s4423_s28, 1 }
  0xf1   : > { %p48_p2 = scmp.eq.s32.totalorder %s47_s27, 0  ;;  %p284_p4 = scmp.eq.s32.totalorder %s2350_s19, 1 }
  0xf2   : > { %p3770_p7 = por %p278_p0, %p57_p1  ;;  %p2871_p9 = scmp.lt.s32.totalorder %s3415_s18, 2 }
  0xf3   : > { %s3776_s3 = scalar_select %p48_p2, %s3403_s15, %s50_s24  }
  0xf4   : > { %s4424_s25 = scalar_select %p3770_p7, 1, 0 }
  0xf5   : > { %p3778_p5 = por %p284_p4, %p63_p11  ;;  %s413_s22 = sand.u32 1, %s3403_s15  }
  0xf6   : > { %s2362_s30 = sshll.u32 %s413_s22, 7  ;;  %s2455_s29 = sshll.u32 %s3411_s17, 11 }
  0xf7   : > { %s4425_s21 = scalar_select %p3778_p5, 1, 0 }
  0xf8   : > { %s4426_s12 = sld [smem:[#allocation32_spill]]  ;;  %s417_s1 = scalar_lea.vmem [#allocation5], %s2362_s30 }
  0xf9   : > { %s425_s19 = sshll.u32 %s417_s1, 4  ;;  %p3793_p10 = pnand %p2871_p9, %p3756_p12  ;;  %s3789_s19 = int_to_ptr.vmem [resolvable:$true] %s425_s19 }
  0xfa   : > { %s3797_s27 = scalar_lea.sflag [#allocation6], %s413_s22 }
  0xfb   : > { %p3285_p1 = pneg %p3793_p10 }
  0xfe   : > { %s3787_s16 = scalar_lea.hbm %s4426_s12, %s2455_s29  ;;  %s3288_s23 = scalar_lea.hbm %s4426_s12, 4096 }
  0xff   : > { %s3283_s28 = scalar_lea.hbm %s3787_s16, 2048  ;;  %p3289_p12 = scmp.lt.u32.totalorder %s3787_s16, %s4426_s12 }
 0x100   : > { %p3284_p8 = scmp.ne.s32.totalorder %s3787_s16, %s3283_s28  ;;  %p3290_p13 = scmp.lt.u32.totalorder %s3288_s23, %s3283_s28 }
 0x101   : > { %p3292_p2 = scmp.lt.u32.totalorder %s3283_s28, %s3787_s16 }
 0x102   : > { %p3286_p3 = pnand %p3285_p1, %p3284_p8  ;;  %p3291_p0 = por %p3290_p13, %p3289_p12 }
 0x104   : > { %p3287_p11 = pneg %p3286_p3  ;;  %p3293_p4 = por %p3292_p2, %p3291_p0 }
 0x106   : > { %p3294_p9 = pnand %p3293_p4, %p3287_p11 }
 0x108   : > { %3297 = shalt.err (!%p3294_p9)
}
 0x109   : > { %s3298_s22 = scalar_lea.vmem %s3789_s19, 2048  ;;  %s3430_s1 = smov [#allocation5]  }
 0x10a   : > { %p3299_p8 = scmp.ne.s32.totalorder %s3789_s19, %s3298_s22  ;;  %s3303_s30 = sshll.u32 %s3430_s1, 4  ;;  %s3304_s30 = int_to_ptr.vmem [resolvable:$false] %s3303_s30 }
 0x10b   : > { %s3305_s29 = scalar_lea.vmem %s3304_s30, 4096  ;;  %p3306_p7 = scmp.lt.s32.totalorder %s3789_s19, %s3304_s30 }
 0x10c   : > { %p3301_p3 = pnand %p3299_p8, %p3285_p1  ;;  %p3307_p12 = scmp.lt.s32.totalorder %s3305_s29, %s3298_s22 }
 0x10e   : > { %p3302_p5 = pneg %p3301_p3  ;;  %p3308_p13 = por %p3307_p12, %p3306_p7 }
 0x110   : > { %p3309_p0 = pnand %p3308_p13, %p3302_p5 }
 0x112   : > { %3312 = shalt.err (!%p3309_p0)
}
 0x113   : > { %s4428_s28 = smov 8   ;;  %s4429_s23 = smov 128  }
 0x114   : > { %2857 = dma.hbm_to_vmem [thread:$0]  (!%p3793_p10), %s3787_s16, 2048, %s3789_s19, %s3797_s27, %s4429_s23, %s4429_s23, %s4428_s28  }
 0x115   : > { %s4430_s10 = sld [smem:[#allocation31_spill]] }
 0x11b   : > { %p4431_p1 = scmp.ne.s32.totalorder %s4430_s10, 0 }
 0x11c   : > { %s3831_s26 = sand.u32 (!%p4431_p1), 1, %s3399_s14  }
 0x11d   : > { %437 = sbr.rel (%p4431_p1) target bundleno = 1714 (0x6b2), region = 60  ;;  %s2367_s22 = sshll.u32 (!%p4431_p1), %s3831_s26, 7 }
 0x11e   : > { %s440_s1 = scalar_lea.sflag (!%p4431_p1), [#allocation6], %s3831_s26  ;;  %s3837_s24 = scalar_lea.vmem (!%p4431_p1), [#allocation5], %s2367_s22 }
 0x124   : > { %3366 = dma.done.wait (%p3762_p6), %s440_s1, 2048  }
 0x125   : > { %3368 = vsyncadd (%p3762_p6), %s440_s1, 4294965248  ;;  %p4432_p7 = scmp.ne.s32.totalorder %s4413_s20, 0 }
 0x127   : > { %3370 = dma.done.wait (%p4432_p7), [#allocation9], 1536  }
 0x128   : > { %3372 = vsyncadd (%p4432_p7), [#allocation9], 4294965760 }
 0x129   : > { %3374 = dma.done.wait (%p4432_p7), [#allocation12], 528  }
 0x12a   : > { %3376 = vsyncadd (%p4432_p7), [#allocation12], 4294966768 }
 0x12b   : > { %3378 = dma.done.wait (%p4432_p7), [#allocation15], 528  }
 0x12c   : > { %3380 = vsyncadd (%p4432_p7), [#allocation15], 4294966768 }
 0x12d   : > { %3382 = dma.done.wait (%p4432_p7), [#allocation18], 528  }
 0x12e   : > { %3384 = vsyncadd (%p4432_p7), [#allocation18], 4294966768 }
 0x12f   : > { %3386 = dma.done.wait (%p4432_p7), [#allocation21], 16  }
 0x130   : > { %3388 = vsyncadd (%p4432_p7), [#allocation21], 4294967280  ;;  %v3431_v0 = vmov 0.0|0.0   ;;  %vm3432_vm0 = vmmov 0   ;;  %v3433_v1 = vmov 0.0   ;;  %v645_v2 = vld [vmem:[#allocation8] sm:$0xff] }
 0x131   : > { %2754 = vmatprep.subr.bf16.mxu1 %v3431_v0  ;;  %2572 = vmatprep.mubr.msk.f32.mxu1 %vm3432_vm0, %v3433_v1  ;;  %v646_v3 = vld [vmem:[#allocation8 + $0x8] sm:$0xff]  ;;  %v647_v4 = vld [vmem:[#allocation8 + $0x10] sm:$0xff]  ;;  %vm540_vm1 = vcmask 523264   ;;  %v648_v6 = vld [vmem:[#allocation8 + $0x18] sm:$0xff]  ;;  %vm655_vm2 = vcmask 1041409   ;;  %s4273_s20 = scalar_lea.vmem [#allocation22], %s2367_s22 }
 0x132   : > { %v3866_v5 = vpack.c.bf16 %v646_v3, %v645_v2  ;;  %v649_v7 = vld [vmem:[#allocation8 + $0x20] sm:$0xff]  ;;  %v650_v8 = vld [vmem:[#allocation8 + $0x28] sm:$0xff]  ;;  %v3872_v10 = vpack.c.bf16 %v648_v6, %v647_v4  ;;  %v3878_v12 = vld [vmem:[%s3837_s24 + $0x10] sm:$0xff]  ;;  %s4433_s11 = sld [smem:[#allocation30_spill]]  ;;  %s2175_s19 = sshll.u32 %s4273_s20, 4  ;;  %s4332_s19 = int_to_ptr.vmem [resolvable:$true] %s2175_s19 }
 0x133   : > { %v3869_v9 = vld [vmem:[%s3837_s24] sm:$0xff]  ;;  %v3875_v11 = vld [vmem:[%s3837_s24 + $0x8] sm:$0xff]  ;;  %v3881_v13 = vld [vmem:[%s3837_s24 + $0x18] sm:$0xff]  ;;  %v544_v19 = vsel %vm540_vm1, %v3878_v12, 0.0  ;;  %v3916_v30 = vpack.c.bf16 %v650_v8, %v649_v7  ;;  %v587_v53 = vmul.f32 %v3878_v12, %v3878_v12  ;;  %s4434_s29 = sld [smem:[#allocation35_spill]]  ;;  %s2159_s23 = scalar_lea.sflag [#allocation7], %s3831_s26 }
 0x134   : > { %2756 = vmatpush3.bf16.msra.mxu1 %v3866_v5  ;;  %v541_v14 = vsel %vm540_vm1, %v3869_v9, 0.0  ;;  %v3887_v15 = vld [vmem:[%s3837_s24 + $0x20] sm:$0xff]  ;;  %v3890_v16 = vld [vmem:[%s3837_s24 + $0x28] sm:$0xff]  ;;  %v3893_v17 = vld [vmem:[%s3837_s24 + $0x30] sm:$0xff]  ;;  %v542_v18 = vsel %vm540_vm1, %v3875_v11, 0.0  ;;  %v546_v20 = vsel %vm540_vm1, %v3881_v13, 0.0  ;;  %v585_v50 = vmul.f32 %v3869_v9, %v3869_v9 }
 0x135   : > { %2757 = vmatprep.subr.bf16.mxu1 %v3431_v0  ;;  %v651_v21 = vld [vmem:[#allocation8 + $0x30] sm:$0xff]  ;;  %v652_v22 = vld [vmem:[#allocation8 + $0x38] sm:$0xff]  ;;  %v3905_v24 = vld [vmem:[%s3837_s24 + $0x40] sm:$0xff]  ;;  %v543_v26 = vadd.f32 %v542_v18, %v541_v14  ;;  %v548_v27 = vsel %vm540_vm1, %v3887_v15, 0.0  ;;  %v550_v28 = vsel %vm540_vm1, %v3890_v16, 0.0  ;;  %v552_v29 = vsel %vm540_vm1, %v3893_v17, 0.0 }
 0x136   : > { %v3902_v23 = vld [vmem:[%s3837_s24 + $0x38] sm:$0xff]  ;;  %v3908_v25 = vld [vmem:[%s3837_s24 + $0x48] sm:$0xff]  ;;  %v3919_v31 = vld [vmem:[%s3837_s24 + $0x50] sm:$0xff]  ;;  %v562_v35 = vsel %vm540_vm1, %v3905_v24, 0.0  ;;  %v3958_v51 = vpack.c.bf16 %v652_v22, %v651_v21  ;;  %v586_v52 = vmul.f32 %v3875_v11, %v3875_v11  ;;  %v588_v56 = vmul.f32 %v3881_v13, %v3881_v13  ;;  %s3313_s10 = scalar_lea.vmem %s4332_s19, 2048  ;;  %p4435_p5 = scmp.ne.s32.totalorder %s4424_s25, 0 }
 0x137   : > { %v3922_v32 = vld [vmem:[%s3837_s24 + $0x58] sm:$0xff]  ;;  %v3925_v33 = vld [vmem:[%s3837_s24 + $0x60] sm:$0xff]  ;;  %v554_v34 = vsel %vm540_vm1, %v3902_v23, 0.0  ;;  %v563_v36 = vsel %vm540_vm1, %v3908_v25, 0.0  ;;  %v3935_v37 = vld [vmem:[%s3837_s24 + $0x68] sm:$0xff]  ;;  %v545_v40 = vadd.f32 %v544_v19, %v543_v26  ;;  %v565_v42 = vsel %vm540_vm1, %v3919_v31, 0.0  ;;  %p3314_p6 = scmp.ne.s32.totalorder %s4332_s19, %s3313_s10 }
 0x138   : > { %2759 = vmatpush3.bf16.msra.mxu1 %v3872_v10  ;;  %v3938_v38 = vld [vmem:[%s3837_s24 + $0x70] sm:$0xff]  ;;  %v3941_v39 = vld [vmem:[%s3837_s24 + $0x78] sm:$0xff]  ;;  %v564_v41 = vadd.f32 %v563_v36, %v562_v35  ;;  %v567_v43 = vsel %vm540_vm1, %v3922_v32, 0.0  ;;  %v569_v44 = vsel %vm540_vm1, %v3925_v33, 0.0  ;;  %v571_v45 = vsel %vm540_vm1, %v3935_v37, 0.0  ;;  %s2457_s16 = sshll.u32 %s4433_s11, 11 }
 0x139   : > { %2760 = vmatprep.subr.bf16.mxu1 %v3431_v0  ;;  %v573_v46 = vsel %vm540_vm1, %v3938_v38, 0.0  ;;  %v575_v47 = vsel %vm540_vm1, %v3941_v39, 0.0  ;;  %v547_v48 = vadd.f32 %v546_v20, %v545_v40  ;;  %v589_v57 = vmul.f32 %v3887_v15, %v3887_v15  ;;  %s4330_s28 = scalar_lea.hbm %s4434_s29, %s2457_s16  ;;  %p3315_p10 = pnand %p3314_p6, %p4435_p5 }
 0x13a   : > { %v566_v49 = vadd.f32 %v565_v42, %v564_v41  ;;  %v590_v58 = vmul.f32 %v3890_v16, %v3890_v16  ;;  %v591_v59 = vmul.f32 %v3893_v17, %v3893_v17  ;;  %v593_v60 = vmul.f32 %v3905_v24, %v3905_v24  ;;  %s3435_s22 = smov [#allocation22]  }
 0x13b   : > { %v549_v54 = vadd.f32 %v548_v27, %v547_v48  ;;  %v594_v61 = vmul.f32 %v3908_v25, %v3908_v25  ;;  %v595_v2 = vmul.f32 %v3919_v31, %v3919_v31  ;;  %v601_v3 = vsel %vm540_vm1, %v585_v50, 0.0  ;;  %p3316_p11 = pneg %p3315_p10  ;;  %s3317_s1 = sshll.u32 %s3435_s22, 4  ;;  %s3318_s1 = int_to_ptr.vmem [resolvable:$false] %s3317_s1 }
 0x13c   : > { %2762 = vmatpush3.bf16.msra.mxu1 %v3916_v30  ;;  %v568_v55 = vadd.f32 %v567_v43, %v566_v49  ;;  %v596_v4 = vmul.f32 %v3922_v32, %v3922_v32  ;;  %v597_v6 = vmul.f32 %v3925_v33, %v3925_v33  ;;  %v602_v7 = vsel %vm540_vm1, %v586_v52, 0.0  ;;  %p3320_p2 = scmp.lt.s32.totalorder %s4332_s19, %s3318_s1 }
 0x13d   : > { %2763 = vmatprep.subr.bf16.mxu1 %v3431_v0  ;;  %v551_v62 = vadd.f32 %v550_v28, %v549_v54  ;;  %v604_v8 = vsel %vm540_vm1, %v587_v53, 0.0  ;;  %v598_v19 = vmul.f32 %v3935_v37, %v3935_v37  ;;  %v603_v20 = vadd.f32 %v602_v7, %v601_v3 }
 0x13e   : > { %v570_v63 = vadd.f32 %v569_v44, %v568_v55  ;;  %v606_v21 = vsel %vm540_vm1, %v588_v56, 0.0  ;;  %v608_v22 = vsel %vm540_vm1, %v589_v57, 0.0  ;;  %v622_v26 = vsel %vm540_vm1, %v593_v60, 0.0 }
 0x13f   : > { %v553_v14 = vadd.f32 %v552_v29, %v551_v62  ;;  %v623_v27 = vsel %vm540_vm1, %v594_v61, 0.0  ;;  %v605_v36 = vadd.f32 %v604_v8, %v603_v20  ;;  %v610_v29 = vsel %vm540_vm1, %v590_v58, 0.0 }
 0x140   : > { %2765 = vmatpush3.bf16.msra.mxu1 %v3958_v51  ;;  %v572_v18 = vadd.f32 %v571_v45, %v570_v63  ;;  %v624_v40 = vadd.f32 %v623_v27, %v622_v26  ;;  %v612_v41 = vsel %vm540_vm1, %v591_v59, 0.0  ;;  %v625_v42 = vsel %vm540_vm1, %v595_v2, 0.0 }
 0x141   : > { %2766 = vmatprep.subr.bf16.mxu1 %v3431_v0  ;;  %v555_v28 = vadd.f32 %v554_v34, %v553_v14  ;;  %v627_v43 = vsel %vm540_vm1, %v596_v4, 0.0  ;;  %v607_v48 = vadd.f32 %v606_v21, %v605_v36  ;;  %v592_v50 = vmul.f32 %v3902_v23, %v3902_v23 }
 0x142   : > { %v574_v35 = vadd.f32 %v573_v46, %v572_v18  ;;  %v626_v49 = vadd.f32 %v625_v42, %v624_v40  ;;  %v599_v34 = vmul.f32 %v3938_v38, %v3938_v38  ;;  %v629_v46 = vsel %vm540_vm1, %v597_v6, 0.0 }
 0x143   : > { %v556_v44 = vrot.slane %v555_v28, 4  ;;  %v631_v52 = vsel %vm540_vm1, %v598_v19, 0.0  ;;  %v609_v55 = vadd.f32 %v608_v22, %v607_v48  ;;  %v600_v57 = vmul.f32 %v3941_v39, %v3941_v39 }
 0x144   : > { %v576_v45 = vadd.f32 %v575_v47, %v574_v35  ;;  %v628_v56 = vadd.f32 %v627_v43, %v626_v49  ;;  %v614_v61 = vsel %vm540_vm1, %v592_v50, 0.0  ;;  %v633_v62 = vsel %vm540_vm1, %v599_v34, 0.0 }
 0x145   : > { %v557_v53 = vadd.f32 %v556_v44, %v555_v28  ;;  %v611_v59 = vadd.f32 %v610_v29, %v609_v55  ;;  %v635_v6 = vsel %vm540_vm1, %v600_v57, 0.0  ;;  %v4023_v55 = vld [vmem:[#allocation16] sm:$0xff]  }
 0x146   : > { %v577_v54 = vrot.slane %v576_v45, 4  ;;  %v630_v60 = vadd.f32 %v629_v46, %v628_v56 }
 0x147   : > { %v558_v47 = vrot.slane %v557_v53, 2  ;;  %v613_v3 = vadd.f32 %v612_v41, %v611_v59  ;;  %v813_v59 = vlaneseq }
 0x148   : > { %v578_v58 = vadd.f32 %v577_v54, %v576_v45  ;;  %v632_v4 = vadd.f32 %v631_v52, %v630_v60  ;;  %v2950_v52 = vld [vmem:[#allocation13] sm:$0xff]   ;;  %v2956_v54 = vld [vmem:[#allocation13 + $0x18] sm:$0xff]  }
 0x149   : > { %v559_v63 = vadd.f32 %v558_v47, %v557_v53  ;;  %v615_v14 = vadd.f32 %v614_v61, %v613_v3  ;;  %v2952_v53 = vld [vmem:[#allocation13 + $0x8] sm:$0xff]   ;;  %v3434_v47 = vmov 1966171168   ;;  %v814_v61 = vshrl.u32 %v813_v59, 7 }
 0x14a   : > { %v579_v2 = vrot.slane %v578_v58, 2  ;;  %v634_v18 = vadd.f32 %v633_v62, %v632_v4 }
 0x14b   : > { %v560_v7 = vrot.slane %v559_v63, 1  ;;  %v616_v21 = vrot.slane %v615_v14, 4 }
 0x14c   : > { %v580_v8 = vadd.f32 %v579_v2, %v578_v58  ;;  %v636_v22 = vadd.f32 %v635_v6, %v634_v18  ;;  %v811_v58 = vunpack.c.l.s4 %v3434_v47 }
 0x14d   : > { %v561_v19 = vadd.f32 %v560_v7, %v559_v63  ;;  %v617_v28 = vadd.f32 %v616_v21, %v615_v14 }
 0x14e   : > { %v581_v20 = vrot.slane %v580_v8, 1  ;;  %v637_v35 = vrot.slane %v636_v22, 4  ;;  %v812_v60 = vunpack.c.0.s8 %v811_v58 }
 0x14f   : > { %v583_v27 = vmul.f32 0.015625, %v561_v19  ;;  %v618_v40 = vrot.slane %v617_v28, 2  ;;  %v834_v19 = vsub.s32 0, %v814_v61 }
 0x150   : > { %v582_v26 = vadd.f32 %v581_v20, %v580_v8  ;;  %v638_v29 = vadd.f32 %v637_v35, %v636_v22  ;;  %v815_v2 = vsub.s32 %v812_v60, %v814_v61  ;;  %v2959_v61 = vld [vmem:[#allocation16 + $0x10] sm:$0xff]  }
 0x151   : > { %v619_v42 = vadd.f32 %v618_v40, %v617_v28 }
 0x152   : > { %v584_v36 = vmul.f32 0.015625, %v582_v26  ;;  %v639_v43 = vrot.slane %v638_v29, 2 }
 0x153   : > { %v620_v44 = vrot.slane %v619_v42, 1 }
 0x154   : > { %v656_v41 = vsel %vm655_vm2, %v584_v36, %v583_v27  ;;  %v640_v45 = vadd.f32 %v639_v43, %v638_v29 }
 0x155   : > { %2573 = vmatmul.mubr.msk.f32.vlgmr.msra.gmra.mrb[0].mxu1 %vm540_vm1, %v656_v41  ;;  %v621_v49 = vadd.f32 %v620_v44, %v619_v42 }
 0x156   : > { %2768 = vmatpush3.bf16.msra.mxu1 %v3866_v5  ;;  %2591 = vmatprep.mubr.msk.f32.mxu1 %vm3432_vm0, %v3433_v1  ;;  %v641_v48 = vrot.slane %v640_v45, 1  ;;  %v2949_v5 = vld [vmem:[#allocation10] sm:$0xff]  }
 0x157   : > { %2769 = vmatprep.subr.bf16.mxu1 %v3431_v0  ;;  %v643_v34 = vmul.f32 0.015625, %v621_v49  ;;  %2594 = vmatprep.subr.bf16.mxu0 %v2949_v5 }
 0x158   : > { %v642_v50 = vadd.f32 %v641_v48, %v640_v45  ;;  %2595 = vmatpush3.bf16.msra.mxu0 %v2949_v5 }
 0x15a   : > { %2771 = vmatpush3.bf16.msra.mxu1 %v3872_v10  ;;  %v644_v46 = vmul.f32 0.015625, %v642_v50  ;;  %v2951_v10 = vld [vmem:[#allocation10 + $0x8] sm:$0xff]  }
 0x15b   : > { %2772 = vmatprep.subr.bf16.mxu1 %v3431_v0  ;;  %2596 = vmatprep.subr.bf16.mxu0 %v2951_v10 }
 0x15c   : > { %v731_v1 = vsel %vm655_vm2, %v644_v46, %v643_v34  ;;  %2597 = vmatpush3.bf16.msra.mxu0 %v2951_v10 }
 0x15e   : > { %2774 = vmatpush3.bf16.msra.mxu1 %v3916_v30  ;;  %v2953_v30 = vld [vmem:[#allocation10 + $0x10] sm:$0xff]  }
 0x15f   : > { %2775 = vmatprep.subr.bf16.mxu1 %v3431_v0  ;;  %v2954_v0 = vld [vmem:[#allocation13 + $0x10] sm:$0xff]   ;;  %2598 = vmatprep.subr.bf16.mxu0 %v2953_v30 }
 0x160   : > { %2599 = vmatpush3.bf16.msra.mxu0 %v2953_v30 }
 0x162   : > { %2777 = vmatpush3.bf16.msra.mxu1 %v3958_v51  ;;  %v2955_v51 = vld [vmem:[#allocation10 + $0x18] sm:$0xff]  }
 0x163   : > { %2618 = vmatprep.subr.bf16.mxu1 %v2950_v52  ;;  %2600 = vmatprep.subr.bf16.mxu0 %v2955_v51 }
 0x164   : > { %2601 = vmatpush3.bf16.msra.mxu0 %v2955_v51 }
 0x165   : > { %2592 = vmatmul.mubr.msk.f32.vlgmr.msra.gmra.mrb[2].mxu1 %vm540_vm1, %v731_v1  ;;  %2642 = vmatprep.subr.bf16.mxu0 %v4023_v55 }
 0x166   : > { %2619 = vmatpush3.bf16.msra.mxu1 %v2950_v52 }
 0x167   : > { %2620 = vmatprep.subr.bf16.mxu1 %v2952_v53 }
 0x16a   : > { %2621 = vmatpush3.bf16.msra.mxu1 %v2952_v53 }
 0x16b   : > { %2622 = vmatprep.subr.bf16.mxu1 %v2954_v0 }
 0x16e   : > { %2623 = vmatpush3.bf16.msra.mxu1 %v2954_v0 }
 0x16f   : > { %2624 = vmatprep.subr.bf16.mxu1 %v2956_v54 }
 0x172   : > { %2625 = vmatpush3.bf16.msra.mxu1 %v2956_v54  ;;  %v2958_v54 = vld [vmem:[#allocation16 + $0x8] sm:$0xff]  }
 0x228   : > { %v725_v56 = vpop.f32.mrb[0].mxu1 }
 0x229   : > { %v2574_v57 = vpop.f32.mrb[1].mxu1  ;;  %v804_v62 = vmul.f32 %v725_v56, %v725_v56  ;;  %v816_v7 = vrot.slane %v725_v56, %v815_v2 }
 0x22b   : > { %v817_v14 = vcombine.high %v816_v7, %v816_v7  ;;  %v824_v18 = vrot.slane %v816_v7, %v815_v2 }
 0x22d   : > { %v831_v20 = vrot.slane %v817_v14, %v815_v2  ;;  %v835_v21 = vrot.slane %v824_v18, %v834_v19 }
 0x22f   : > { %v839_v26 = vrot.slane %v831_v20, %v834_v19  ;;  %v842_v28 = vsub.f32 %v3869_v9, %v835_v21  ;;  %v843_v35 = vsub.f32 %v3875_v11, %v835_v21  ;;  %v844_v36 = vsub.f32 %v3878_v12, %v835_v21 }
 0x230   : > { %v845_v40 = vsub.f32 %v3881_v13, %v835_v21  ;;  %v846_v42 = vsub.f32 %v3887_v15, %v835_v21  ;;  %v847_v43 = vsub.f32 %v3890_v16, %v835_v21  ;;  %v848_v44 = vsub.f32 %v3893_v17, %v835_v21 }
 0x231   : > { %v849_v45 = vsub.f32 %v3902_v23, %v835_v21  ;;  %v850_v48 = vsub.f32 %v3905_v24, %v839_v26  ;;  %v851_v9 = vsub.f32 %v3908_v25, %v839_v26  ;;  %v852_v12 = vsub.f32 %v3919_v31, %v839_v26 }
 0x232   : > { %v853_v13 = vsub.f32 %v3922_v32, %v839_v26  ;;  %v854_v50 = vsub.f32 %v3925_v33, %v839_v26  ;;  %v855_v15 = vsub.f32 %v3935_v37, %v839_v26  ;;  %v856_v16 = vsub.f32 %v3938_v38, %v839_v26 }
 0x233   : > { %v857_v17 = vsub.f32 %v3941_v39, %v839_v26 }
 0x238   : > { %v800_v63 = vpop.f32.mrb[2].mxu1 }
 0x239   : > { %v805_v3 = vsub.f32 %v800_v63, %v804_v62  ;;  %v2593_v4 = vpop.f32.mrb[3].mxu1  ;;  %v2960_v62 = vld [vmem:[#allocation16 + $0x18] sm:$0xff]  }
 0x23a   : > { %v4067_v63 = vld [vmem:[#allocation11] ss:$0 sm:$0xff] }
 0x23b   : > { %v806_v6 = vmax.f32 %v805_v3, 0.0  ;;  %v4069_v3 = vld [vmem:[#allocation14] ss:$0 sm:$0xff] }
 0x23d   : > { %v807_v8 = vadd.f32 1e-06, %v806_v6 }
 0x23f   : > { %2965 = vrsqrt.f32 %v807_v8 }
 0x249   : > { %v2966_v22 = vpop.eup %2965 }
 0x24a   : > { %v865_v27 = vrot.slane %v2966_v22, %v815_v2 }
 0x24c   : > { %v866_v29 = vcombine.high %v865_v27, %v865_v27  ;;  %v873_v41 = vrot.slane %v865_v27, %v815_v2 }
 0x24e   : > { %v880_v49 = vrot.slane %v866_v29, %v815_v2  ;;  %v884_v11 = vrot.slane %v873_v41, %v834_v19 }
 0x250   : > { %v888_v34 = vrot.slane %v880_v49, %v834_v19  ;;  %v891_v23 = vmul.f32 %v884_v11, %v842_v28  ;;  %v892_v46 = vmul.f32 %v884_v11, %v843_v35  ;;  %v893_v24 = vmul.f32 %v884_v11, %v844_v36 }
 0x251   : > { %v894_v1 = vmul.f32 %v884_v11, %v845_v40  ;;  %v895_v25 = vmul.f32 %v884_v11, %v846_v42  ;;  %v896_v5 = vmul.f32 %v884_v11, %v847_v43  ;;  %v897_v52 = vmul.f32 %v884_v11, %v848_v44 }
 0x252   : > { %v907_v10 = vpack.c.bf16 %v892_v46, %v891_v23  ;;  %v898_v31 = vmul.f32 %v884_v11, %v849_v45  ;;  %v899_v53 = vmul.f32 %v888_v34, %v850_v48  ;;  %v900_v32 = vmul.f32 %v888_v34, %v851_v9 }
 0x253   : > { %v908_v30 = vpack.c.bf16 %v894_v1, %v893_v24  ;;  %v909_v33 = vpack.c.bf16 %v896_v5, %v895_v25  ;;  %v901_v0 = vmul.f32 %v888_v34, %v852_v12  ;;  %v902_v37 = vmul.f32 %v888_v34, %v853_v13 }
 0x254   : > { %2602 = vmatprep.mubr.msk.bf16.mxu0 %vm540_vm1, %v907_v10  ;;  %2626 = vmatprep.mubr.msk.bf16.mxu1 %vm540_vm1, %v907_v10  ;;  %v910_v38 = vpack.c.bf16 %v898_v31, %v897_v52  ;;  %v911_v39 = vpack.c.bf16 %v900_v32, %v899_v53  ;;  %v903_v51 = vmul.f32 %v888_v34, %v854_v50 }
 0x255   : > { %2603 = vmatmul.mubr.msk.bf16.vlgmr.msra.gmra.mrb[0].mxu0 %vm540_vm1, %v908_v30  ;;  %2627 = vmatmul.mubr.msk.bf16.vlgmr.msra.gmra.mrb[4].mxu1 %vm540_vm1, %v908_v30  ;;  %v912_v56 = vpack.c.bf16 %v902_v37, %v901_v0  ;;  %v904_v57 = vmul.f32 %v888_v34, %v855_v15  ;;  %v905_v47 = vmul.f32 %v888_v34, %v856_v16 }
 0x256   : > { %2606 = vmatprep.mubr.msk.bf16.mxu0 %vm540_vm1, %v909_v33  ;;  %2630 = vmatprep.mubr.msk.bf16.mxu1 %vm540_vm1, %v909_v33  ;;  %v906_v58 = vmul.f32 %v888_v34, %v857_v17 }
 0x257   : > { %v913_v59 = vpack.c.bf16 %v904_v57, %v903_v51  ;;  %2643 = vmatpush3.bf16.msra.mxu0 %v4023_v55 }
 0x258   : > { %2644 = vmatprep.subr.bf16.mxu0 %v2958_v54  ;;  %v914_v60 = vpack.c.bf16 %v906_v58, %v905_v47 }
 0x25b   : > { %2645 = vmatpush3.bf16.msra.mxu0 %v2958_v54 }
 0x25c   : > { %2646 = vmatprep.subr.bf16.mxu0 %v2959_v61 }
 0x25d   : > { %2607 = vmatmul.mubr.msk.bf16.gmra.mrb[4].mxu0 %vm540_vm1, %v910_v38  ;;  %2631 = vmatmul.mubr.msk.bf16.gmra.mrb[8].mxu1 %vm540_vm1, %v910_v38 }
 0x25e   : > { %2610 = vmatprep.mubr.msk.bf16.mxu0 %vm540_vm1, %v911_v39  ;;  %2634 = vmatprep.mubr.msk.bf16.mxu1 %vm540_vm1, %v911_v39 }
 0x25f   : > { %2647 = vmatpush3.bf16.msra.mxu0 %v2959_v61 }
 0x260   : > { %2648 = vmatprep.subr.bf16.mxu0 %v2960_v62 }
 0x263   : > { %2649 = vmatpush3.bf16.msra.mxu0 %v2960_v62 }
 0x265   : > { %2611 = vmatmul.mubr.msk.bf16.gmra.mrb[8].mxu0 %vm540_vm1, %v912_v56  ;;  %2635 = vmatmul.mubr.msk.bf16.gmra.mrb[12].mxu1 %vm540_vm1, %v912_v56 }
 0x266   : > { %2614 = vmatprep.mubr.msk.bf16.mxu0 %vm540_vm1, %v913_v59  ;;  %2638 = vmatprep.mubr.msk.bf16.mxu1 %vm540_vm1, %v913_v59 }
 0x26d   : > { %2615 = vmatmul.mubr.msk.bf16.gmra.mrb[12].mxu0 %vm540_vm1, %v914_v60  ;;  %2639 = vmatmul.mubr.msk.bf16.gmra.mrb[16].mxu1 %vm540_vm1, %v914_v60 }
 0x26e   : > { %2650 = vmatprep.mubr.msk.bf16.mxu0 %vm540_vm1, %v907_v10 }
 0x275   : > { %2651 = vmatmul.mubr.msk.bf16.vlgmr.msra.gmra.mrb[16].mxu0 %vm540_vm1, %v908_v30 }
 0x276   : > { %2654 = vmatprep.mubr.msk.bf16.mxu0 %vm540_vm1, %v909_v33 }
 0x27d   : > { %2655 = vmatmul.mubr.msk.bf16.gmra.mrb[20].mxu0 %vm540_vm1, %v910_v38 }
 0x27e   : > { %2658 = vmatprep.mubr.msk.bf16.mxu0 %vm540_vm1, %v911_v39 }
 0x285   : > { %2659 = vmatmul.mubr.msk.bf16.gmra.mrb[24].mxu0 %vm540_vm1, %v912_v56 }
 0x286   : > { %2662 = vmatprep.mubr.msk.bf16.mxu0 %vm540_vm1, %v913_v59 }
 0x28d   : > { %2663 = vmatmul.mubr.msk.bf16.gmra.mrb[28].mxu0 %vm540_vm1, %v914_v60 }
 0x328   : > { %v2604_v55 = vpop.f32.mrb[0].mxu0  ;;  %v2628_v2 = vpop.f32.mrb[4].mxu1 }
 0x329   : > { %v1012_v4 = vpop.f32.mrb[1].mxu0  ;;  %v1164_v6 = vpop.f32.mrb[5].mxu1  ;;  %v1021_v14 = vadd.f32 %v2604_v55, %v4067_v63  ;;  %v1173_v18 = vadd.f32 %v2628_v2, %v4069_v3 }
 0x32a   : > { %v2605_v7 = vpop.f32.mrb[2].mxu0  ;;  %v2629_v8 = vpop.f32.mrb[6].mxu1  ;;  %v1013_v26 = vadd.f32 %v4067_v63, %v1012_v4  ;;  %v1165_v27 = vadd.f32 %v4069_v3, %v1164_v6 }
 0x32b   : > { %v1024_v19 = vadd.f32 %v2605_v7, %v4067_v63  ;;  %v1176_v20 = vadd.f32 %v2629_v8, %v4069_v3  ;;  %v1015_v21 = vpop.f32.mrb[3].mxu0  ;;  %v1167_v22 = vpop.f32.mrb[7].mxu1 }
 0x32c   : > { %v1016_v28 = vadd.f32 %v4067_v63, %v1015_v21  ;;  %v1168_v35 = vadd.f32 %v4069_v3, %v1167_v22 }
 0x32d   : > { %v1076_v36 = vpack.c.bf16 %v1024_v19, %v1021_v14  ;;  %v1228_v40 = vpack.c.bf16 %v1176_v20, %v1173_v18 }
 0x32e   : > { %v1075_v29 = vpack.c.bf16 %v1016_v28, %v1013_v26  ;;  %v1227_v41 = vpack.c.bf16 %v1168_v35, %v1165_v27 }
 0x32f   : > { %1084 = vst.msk [vmem:[#allocation2 + $0x8] sm:$0xff] %vm540_vm1, %v1076_v36  ;;  %1236 = vst.msk [vmem:[#allocation3 + $0x8] sm:$0xff] %vm540_vm1, %v1228_v40 }
 0x330   : > { %1083 = vst.msk [vmem:[#allocation2] sm:$0xff] %vm540_vm1, %v1075_v29  ;;  %1235 = vst.msk [vmem:[#allocation3] sm:$0xff] %vm540_vm1, %v1227_v41  ;;  %v2608_v42 = vpop.f32.mrb[4].mxu0  ;;  %v2632_v43 = vpop.f32.mrb[8].mxu1 }
 0x331   : > { %v1028_v44 = vpop.f32.mrb[5].mxu0  ;;  %v1180_v45 = vpop.f32.mrb[9].mxu1  ;;  %v1037_v49 = vadd.f32 %v2608_v42, %v4067_v63  ;;  %v1189_v11 = vadd.f32 %v2632_v43, %v4069_v3 }
 0x332   : > { %v2609_v48 = vpop.f32.mrb[6].mxu0  ;;  %v2633_v9 = vpop.f32.mrb[10].mxu1  ;;  %v1029_v16 = vadd.f32 %v4067_v63, %v1028_v44  ;;  %v1181_v17 = vadd.f32 %v4069_v3, %v1180_v45 }
 0x333   : > { %v1040_v12 = vadd.f32 %v2609_v48, %v4067_v63  ;;  %v1192_v13 = vadd.f32 %v2633_v9, %v4069_v3  ;;  %v1031_v50 = vpop.f32.mrb[7].mxu0  ;;  %v1183_v15 = vpop.f32.mrb[11].mxu1 }
 0x334   : > { %v1032_v34 = vadd.f32 %v4067_v63, %v1031_v50  ;;  %v1184_v23 = vadd.f32 %v4069_v3, %v1183_v15 }
 0x335   : > { %v1078_v46 = vpack.c.bf16 %v1040_v12, %v1037_v49  ;;  %v1230_v24 = vpack.c.bf16 %v1192_v13, %v1189_v11  ;;  %v4125_v11 = vld [vmem:[#allocation17] ss:$0 sm:$0xff] }
 0x336   : > { %v1077_v1 = vpack.c.bf16 %v1032_v34, %v1029_v16  ;;  %v1229_v25 = vpack.c.bf16 %v1184_v23, %v1181_v17  ;;  %v1409_v33 = vld [vmem:[#allocation3 + $0x8] sm:$0xff] }
 0x337   : > { %1086 = vst.msk [vmem:[#allocation2 + $0x18] sm:$0xff] %vm540_vm1, %v1078_v46  ;;  %1238 = vst.msk [vmem:[#allocation3 + $0x18] sm:$0xff] %vm540_vm1, %v1230_v24  ;;  %v1408_v5 = vld [vmem:[#allocation3] sm:$0xff]  ;;  %v1433_v7 = vsel %vm540_vm1, %v1409_v33, 0 }
 0x338   : > { %v1400_v52 = vld [vmem:[#allocation2] sm:$0xff]  ;;  %1085 = vst.msk [vmem:[#allocation2 + $0x10] sm:$0xff] %vm540_vm1, %v1077_v1  ;;  %1237 = vst.msk [vmem:[#allocation3 + $0x10] sm:$0xff] %vm540_vm1, %v1229_v25  ;;  %v2612_v10 = vpop.f32.mrb[8].mxu0  ;;  %v2636_v31 = vpop.f32.mrb[12].mxu1  ;;  %2778 = vmatprep.subr.msk.bf16.mxu1 %vm540_vm1, %v1408_v5  ;;  %v1430_v53 = vsel %vm540_vm1, %v1408_v5, 0 }
 0x339   : > { %2674 = vmatprep.mubr.msk.bf16.mxu1 %vm540_vm1, %v1400_v52  ;;  %v1044_v32 = vpop.f32.mrb[9].mxu0  ;;  %v1196_v30 = vpop.f32.mrb[13].mxu1  ;;  %2667 = vmatpush3.bf16.xpose.msra.mxu1 %v1430_v53  ;;  %v1053_v38 = vadd.f32 %v2612_v10, %v4067_v63  ;;  %v1205_v39 = vadd.f32 %v2636_v31, %v4069_v3 }
 0x33a   : > { %v2613_v0 = vpop.f32.mrb[10].mxu0  ;;  %v2637_v37 = vpop.f32.mrb[14].mxu1  ;;  %2779 = vmatprep.subr.msk.bf16.mxu1 %vm540_vm1, %v1409_v33  ;;  %v1045_v47 = vadd.f32 %v4067_v63, %v1044_v32  ;;  %v1197_v58 = vadd.f32 %v4069_v3, %v1196_v30 }
 0x33b   : > { %v1056_v51 = vadd.f32 %v2613_v0, %v4067_v63  ;;  %v1208_v54 = vadd.f32 %v2637_v37, %v4069_v3  ;;  %v1047_v56 = vpop.f32.mrb[11].mxu0  ;;  %v1199_v57 = vpop.f32.mrb[15].mxu1 }
 0x33c   : > { %v1048_v59 = vadd.f32 %v4067_v63, %v1047_v56  ;;  %v1200_v60 = vadd.f32 %v4069_v3, %v1199_v57 }
 0x33d   : > { %v1080_v61 = vpack.c.bf16 %v1056_v51, %v1053_v38  ;;  %v1232_v62 = vpack.c.bf16 %v1208_v54, %v1205_v39  ;;  %v1401_v51 = vld [vmem:[#allocation2 + $0x8] sm:$0xff] }
 0x33e   : > { %v1079_v55 = vpack.c.bf16 %v1048_v59, %v1045_v47  ;;  %v1231_v2 = vpack.c.bf16 %v1200_v60, %v1197_v58  ;;  %v1411_v13 = vld [vmem:[#allocation3 + $0x18] sm:$0xff] }
 0x33f   : > { %1088 = vst.msk [vmem:[#allocation2 + $0x28] sm:$0xff] %vm540_vm1, %v1080_v61  ;;  %1240 = vst.msk [vmem:[#allocation3 + $0x28] sm:$0xff] %vm540_vm1, %v1232_v62  ;;  %v1410_v18 = vld [vmem:[#allocation3 + $0x10] sm:$0xff]  ;;  %v1439_v5 = vsel %vm540_vm1, %v1411_v13, 0 }
 0x340   : > { %1087 = vst.msk [vmem:[#allocation2 + $0x20] sm:$0xff] %vm540_vm1, %v1079_v55  ;;  %1239 = vst.msk [vmem:[#allocation3 + $0x20] sm:$0xff] %vm540_vm1, %v1231_v2  ;;  %v2616_v4 = vpop.f32.mrb[12].mxu0  ;;  %v2640_v6 = vpop.f32.mrb[16].mxu1  ;;  %v1402_v57 = vld [vmem:[#allocation2 + $0x10] sm:$0xff] }
 0x341   : > { %v1060_v8 = vpop.f32.mrb[13].mxu0  ;;  %v1212_v14 = vpop.f32.mrb[17].mxu1  ;;  %2669 = vmatpush3.bf16.xpose.msra.mxu1 %v1433_v7  ;;  %v1069_v21 = vadd.f32 %v2616_v4, %v4067_v63  ;;  %v1221_v22 = vadd.f32 %v2640_v6, %v4069_v3 }
 0x342   : > { %v2617_v19 = vpop.f32.mrb[14].mxu0  ;;  %v2641_v20 = vpop.f32.mrb[18].mxu1  ;;  %2780 = vmatprep.subr.msk.bf16.mxu1 %vm540_vm1, %v1410_v18  ;;  %v1061_v36 = vadd.f32 %v4067_v63, %v1060_v8  ;;  %v1213_v40 = vadd.f32 %v4069_v3, %v1212_v14  ;;  %v1403_v14 = vld [vmem:[#allocation2 + $0x18] sm:$0xff] }
 0x343   : > { %v1072_v26 = vadd.f32 %v2617_v19, %v4067_v63  ;;  %v1224_v27 = vadd.f32 %v2641_v20, %v4069_v3  ;;  %v1063_v28 = vpop.f32.mrb[15].mxu0  ;;  %v1215_v35 = vpop.f32.mrb[19].mxu1 }
 0x344   : > { %v1064_v29 = vadd.f32 %v4067_v63, %v1063_v28  ;;  %v1216_v41 = vadd.f32 %v4069_v3, %v1215_v35  ;;  %v1436_v63 = vsel %vm540_vm1, %v1410_v18, 0 }
 0x345   : > { %v1082_v42 = vpack.c.bf16 %v1072_v26, %v1069_v21  ;;  %v1234_v43 = vpack.c.bf16 %v1224_v27, %v1221_v22 }
 0x346   : > { %v1081_v44 = vpack.c.bf16 %v1064_v29, %v1061_v36  ;;  %v1233_v45 = vpack.c.bf16 %v1216_v41, %v1213_v40  ;;  %v1413_v50 = vld [vmem:[#allocation3 + $0x28] sm:$0xff] }
 0x347   : > { %1090 = vst.msk [vmem:[#allocation2 + $0x38] sm:$0xff] %vm540_vm1, %v1082_v42  ;;  %1242 = vst.msk [vmem:[#allocation3 + $0x38] sm:$0xff] %vm540_vm1, %v1234_v43  ;;  %v1412_v48 = vld [vmem:[#allocation3 + $0x20] sm:$0xff]  ;;  %v1522_v52 = vsel %vm540_vm1, %v1413_v50, 0  ;;  %v1405_v42 = vld [vmem:[#allocation2 + $0x28] sm:$0xff] }
 0x348   : > { %v1404_v9 = vld [vmem:[#allocation2 + $0x20] sm:$0xff]  ;;  %1089 = vst.msk [vmem:[#allocation2 + $0x30] sm:$0xff] %vm540_vm1, %v1081_v44  ;;  %1241 = vst.msk [vmem:[#allocation3 + $0x30] sm:$0xff] %vm540_vm1, %v1233_v45  ;;  %v2652_v49 = vpop.f32.mrb[16].mxu0  ;;  %2782 = vmatprep.subr.msk.bf16.mxu0 %vm540_vm1, %v1412_v48  ;;  %v1519_v3 = vsel %vm540_vm1, %v1412_v48, 0 }
 0x349   : > { %2690 = vmatprep.mubr.msk.bf16.mxu0 %vm540_vm1, %v1404_v9  ;;  %v1316_v12 = vpop.f32.mrb[17].mxu0  ;;  %2671 = vmatpush3.bf16.xpose.msra.mxu1 %v1436_v63  ;;  %v1325_v16 = vadd.f32 %v2652_v49, %v4125_v11 }
 0x34a   : > { %2683 = vmatpush3.bf16.xpose.msra.mxu0 %v1519_v3  ;;  %v2653_v15 = vpop.f32.mrb[18].mxu0  ;;  %2781 = vmatprep.subr.msk.bf16.mxu1 %vm540_vm1, %v1411_v13  ;;  %v1317_v23 = vadd.f32 %v4125_v11, %v1316_v12 }
 0x34b   : > { %2783 = vmatprep.subr.msk.bf16.mxu0 %vm540_vm1, %v1413_v50  ;;  %v1328_v17 = vadd.f32 %v2653_v15, %v4125_v11  ;;  %v1319_v34 = vpop.f32.mrb[19].mxu0 }
 0x34c   : > { %v1320_v46 = vadd.f32 %v4125_v11, %v1319_v34 }
 0x34d   : > { %v1380_v24 = vpack.c.bf16 %v1328_v17, %v1325_v16 }
 0x34e   : > { %v1379_v1 = vpack.c.bf16 %v1320_v46, %v1317_v23  ;;  %v1415_v59 = vld [vmem:[#allocation3 + $0x38] sm:$0xff] }
 0x34f   : > { %1388 = vst.msk [vmem:[#allocation4 + $0x8] sm:$0xff] %vm540_vm1, %v1380_v24  ;;  %v1414_v31 = vld [vmem:[#allocation3 + $0x30] sm:$0xff]  ;;  %v1528_v20 = vsel %vm540_vm1, %v1415_v59, 0  ;;  %v1407_v45 = vld [vmem:[#allocation2 + $0x38] sm:$0xff] }
 0x350   : > { %1387 = vst.msk [vmem:[#allocation4] sm:$0xff] %vm540_vm1, %v1379_v1  ;;  %v2656_v25 = vpop.f32.mrb[20].mxu0  ;;  %v1525_v47 = vsel %vm540_vm1, %v1414_v31, 0  ;;  %v1406_v44 = vld [vmem:[#allocation2 + $0x30] sm:$0xff] }
 0x351   : > { %v1332_v10 = vpop.f32.mrb[21].mxu0  ;;  %2673 = vmatpush3.bf16.xpose.msra.mxu1 %v1439_v5  ;;  %v1341_v32 = vadd.f32 %v2656_v25, %v4125_v11 }
 0x352   : > { %2685 = vmatpush3.bf16.xpose.msra.mxu0 %v1522_v52  ;;  %v2657_v53 = vpop.f32.mrb[22].mxu0  ;;  %v1333_v0 = vadd.f32 %v4125_v11, %v1332_v10 }
 0x353   : > { %2784 = vmatprep.subr.msk.bf16.mxu0 %vm540_vm1, %v1414_v31  ;;  %v1344_v30 = vadd.f32 %v2657_v53, %v4125_v11  ;;  %v1335_v33 = vpop.f32.mrb[23].mxu0 }
 0x354   : > { %v1336_v37 = vadd.f32 %v4125_v11, %v1335_v33 }
 0x355   : > { %v1382_v38 = vpack.c.bf16 %v1344_v30, %v1341_v32 }
 0x356   : > { %v1381_v39 = vpack.c.bf16 %v1336_v37, %v1333_v0  ;;  %v1748_v61 = vld [vmem:[#allocation4 + $0x8] sm:$0xff] }
 0x357   : > { %1390 = vst.msk [vmem:[#allocation4 + $0x18] sm:$0xff] %vm540_vm1, %v1382_v38  ;;  %v1747_v54 = vld [vmem:[#allocation4] sm:$0xff] }
 0x358   : > { %1389 = vst.msk [vmem:[#allocation4 + $0x10] sm:$0xff] %vm540_vm1, %v1381_v39  ;;  %v2660_v56 = vpop.f32.mrb[24].mxu0  ;;  %2675 = vmatmul.mubr.msk.bf16.vlgmr.msra.gmra.mrb[20].mxu1 %vm540_vm1, %v1401_v51  ;;  %2698 = vmatprep.subr.bf16.mxu1 %v1747_v54 }
 0x359   : > { %v1348_v58 = vpop.f32.mrb[25].mxu0  ;;  %2678 = vmatprep.mubr.msk.bf16.mxu1 %vm540_vm1, %v1402_v57  ;;  %2699 = vmatpush3.bf16.msra.mxu1 %v1747_v54  ;;  %v1357_v62 = vadd.f32 %v2660_v56, %v4125_v11 }
 0x35a   : > { %2687 = vmatpush3.bf16.xpose.msra.mxu0 %v1525_v47  ;;  %v2661_v60 = vpop.f32.mrb[26].mxu0  ;;  %2700 = vmatprep.subr.bf16.mxu1 %v1748_v61  ;;  %v1349_v4 = vadd.f32 %v4125_v11, %v1348_v58 }
 0x35b   : > { %2785 = vmatprep.subr.msk.bf16.mxu0 %vm540_vm1, %v1415_v59  ;;  %v1360_v55 = vadd.f32 %v2661_v60, %v4125_v11  ;;  %v1351_v2 = vpop.f32.mrb[27].mxu0 }
 0x35c   : > { %v1352_v6 = vadd.f32 %v4125_v11, %v1351_v2 }
 0x35d   : > { %v1384_v7 = vpack.c.bf16 %v1360_v55, %v1357_v62  ;;  %2701 = vmatpush3.bf16.msra.mxu1 %v1748_v61 }
 0x35e   : > { %v1383_v8 = vpack.c.bf16 %v1352_v6, %v1349_v4  ;;  %v1750_v26 = vld [vmem:[#allocation4 + $0x18] sm:$0xff] }
 0x35f   : > { %1392 = vst.msk [vmem:[#allocation4 + $0x28] sm:$0xff] %vm540_vm1, %v1384_v7  ;;  %v1749_v18 = vld [vmem:[#allocation4 + $0x10] sm:$0xff] }
 0x360   : > { %1391 = vst.msk [vmem:[#allocation4 + $0x20] sm:$0xff] %vm540_vm1, %v1383_v8  ;;  %v2664_v19 = vpop.f32.mrb[28].mxu0  ;;  %2679 = vmatmul.mubr.msk.bf16.gmra.mrb[24].mxu1 %vm540_vm1, %v1403_v14  ;;  %2702 = vmatprep.subr.bf16.mxu1 %v1749_v18 }
 0x361   : > { %v1364_v21 = vpop.f32.mrb[29].mxu0  ;;  %2703 = vmatpush3.bf16.msra.mxu1 %v1749_v18  ;;  %v1373_v27 = vadd.f32 %v2664_v19, %v4125_v11 }
 0x362   : > { %2689 = vmatpush3.bf16.xpose.msra.mxu0 %v1528_v20  ;;  %v2665_v22 = vpop.f32.mrb[30].mxu0  ;;  %2704 = vmatprep.subr.bf16.mxu1 %v1750_v26  ;;  %v1365_v36 = vadd.f32 %v4125_v11, %v1364_v21 }
 0x363   : > { %v1376_v28 = vadd.f32 %v2665_v22, %v4125_v11  ;;  %v1367_v35 = vpop.f32.mrb[31].mxu0 }
 0x364   : > { %v1368_v40 = vadd.f32 %v4125_v11, %v1367_v35 }
 0x365   : > { %v1386_v29 = vpack.c.bf16 %v1376_v28, %v1373_v27  ;;  %2705 = vmatpush3.bf16.msra.mxu1 %v1750_v26 }
 0x366   : > { %v1385_v41 = vpack.c.bf16 %v1368_v40, %v1365_v36 }
 0x367   : > { %1394 = vst.msk [vmem:[#allocation4 + $0x38] sm:$0xff] %vm540_vm1, %v1386_v29  ;;  %v4165_v43 = vld [vmem:[#allocation4 + $0x20] sm:$0xff] }
 0x368   : > { %1393 = vst.msk [vmem:[#allocation4 + $0x30] sm:$0xff] %vm540_vm1, %v1385_v41  ;;  %2714 = vmatprep.subr.bf16.mxu1 %v4165_v43 }
 0x369   : > { %2691 = vmatmul.mubr.msk.bf16.vlgmr.msra.gmra.mrb[32].mxu0 %vm540_vm1, %v1405_v42 }
 0x36a   : > { %2694 = vmatprep.mubr.msk.bf16.mxu0 %vm540_vm1, %v1406_v44 }
 0x371   : > { %2695 = vmatmul.mubr.msk.bf16.gmra.mrb[36].mxu0 %vm540_vm1, %v1407_v45 }
 0x42b   : > { %v2676_v48 = vpop.f32.mrb[20].mxu1 }
 0x42c   : > { %v1475_v9 = vpop.f32.mrb[21].mxu1  ;;  %v1601_v49 = vsel %vm540_vm1, %v2676_v48, -inf }
 0x42d   : > { %1602 = vmax.xlane.f32.xlu1 %v1601_v49  ;;  %v2677_v11 = vpop.f32.mrb[22].mxu1  ;;  %v1595_v63 = vsel %vm540_vm1, %v1475_v9, -inf }
 0x42e   : > { %1596 = vmax.xlane.f32.xlu0 %v1595_v63  ;;  %v1478_v3 = vpop.f32.mrb[23].mxu1  ;;  %v1604_v12 = vsel %vm540_vm1, %v2677_v11, -inf }
 0x42f   : > { %v1598_v13 = vsel %vm540_vm1, %v1478_v3, -inf }
 0x431   : > { %1605 = vmax.xlane.f32.xlu1 %v1604_v12 }
 0x432   : > { %1599 = vmax.xlane.f32.xlu0 %v1598_v13 }
 0x433   : > { %v4176_v50 = vpop.f32.mrb[24].mxu1 }
 0x434   : > { %v1491_v15 = vpop.f32.mrb[25].mxu1  ;;  %v1613_v46 = vsel %vm540_vm1, %v4176_v50, -inf }
 0x435   : > { %v4178_v16 = vpop.f32.mrb[26].mxu1  ;;  %v1607_v17 = vsel %vm540_vm1, %v1491_v15, -inf }
 0x436   : > { %1608 = vmax.xlane.f32.xlu0 %v1607_v17  ;;  %v1494_v34 = vpop.f32.mrb[27].mxu1  ;;  %v1616_v1 = vsel %vm540_vm1, %v4178_v16, -inf }
 0x437   : > { %v1610_v23 = vsel %vm540_vm1, %v1494_v34, -inf }
 0x438   : > { %1611 = vmax.xlane.f32.xlu1 %v1610_v23 }
 0x43a   : > { %1614 = vmax.xlane.f32.xlu0 %v1613_v46  ;;  %v1752_v46 = vld [vmem:[#allocation4 + $0x28] sm:$0xff] }
 0x43c   : > { %v4184_v24 = vpop.f32.mrb[32].mxu0  ;;  %1617 = vmax.xlane.f32.xlu1 %v1616_v1 }
 0x43d   : > { %v4188_v25 = vpop.f32.mrb[33].mxu0  ;;  %v1625_v53 = vsel %vm540_vm1, %v4184_v24, -inf }
 0x43e   : > { %v4190_v5 = vpop.f32.mrb[34].mxu0  ;;  %v1619_v52 = vsel %vm540_vm1, %v4188_v25, -inf }
 0x43f   : > { %v4194_v10 = vpop.f32.mrb[35].mxu0  ;;  %1620 = vmax.xlane.f32.xlu0 %v1619_v52  ;;  %v1628_v30 = vsel %vm540_vm1, %v4190_v5, -inf }
 0x440   : > { %v1622_v31 = vsel %vm540_vm1, %v4194_v10, -inf }
 0x441   : > { %1623 = vmax.xlane.f32.xlu1 %v1622_v31 }
 0x443   : > { %1626 = vmax.xlane.f32.xlu0 %v1625_v53 }
 0x444   : > { %v4200_v32 = vpop.f32.mrb[36].mxu0 }
 0x445   : > { %v4204_v33 = vpop.f32.mrb[37].mxu0  ;;  %1629 = vmax.xlane.f32.xlu1 %v1628_v30  ;;  %v1637_v51 = vsel %vm540_vm1, %v4200_v32, -inf }
 0x446   : > { %v4206_v0 = vpop.f32.mrb[38].mxu0  ;;  %v1631_v37 = vsel %vm540_vm1, %v4204_v33, -inf }
 0x447   : > { %v4210_v38 = vpop.f32.mrb[39].mxu0  ;;  %1632 = vmax.xlane.f32.xlu0 %v1631_v37  ;;  %v1640_v54 = vsel %vm540_vm1, %v4206_v0, -inf }
 0x448   : > { %v1634_v39 = vsel %vm540_vm1, %v4210_v38, -inf }
 0x449   : > { %1635 = vmax.xlane.f32.xlu1 %v1634_v39  ;;  %v1753_v39 = vld [vmem:[#allocation4 + $0x30] sm:$0xff] }
 0x44b   : > { %1638 = vmax.xlane.f32.xlu0 %v1637_v51 }
 0x44d   : > { %1641 = vmax.xlane.f32.xlu1 %v1640_v54 }
 0x4ba   : > { %v1603_v56 = vpop.xlane.xlu1 %1602 }
 0x4bb   : > { %v1645_v57 = vsub.f32 %v2676_v48, %v1603_v56  ;;  %v1597_v47 = vpop.xlane.xlu0 %1596 }
 0x4bc   : > { %v1643_v58 = vsub.f32 %v1475_v9, %v1597_v47 }
 0x4bd   : > { %v1663_v59 = vmul.f32 1.442695, %v1645_v57 }
 0x4be   : > { %v1659_v60 = vmul.f32 1.442695, %v1643_v58  ;;  %v1606_v61 = vpop.xlane.xlu1 %1605 }
 0x4bf   : > { %v1646_v62 = vsub.f32 %v2677_v11, %v1606_v61  ;;  %v1600_v55 = vpop.xlane.xlu0 %1599 }
 0x4c0   : > { %2967 = vpow2.f32 %v1659_v60  ;;  %v1644_v2 = vsub.f32 %v1478_v3, %v1600_v55 }
 0x4c1   : > { %v1665_v4 = vmul.f32 1.442695, %v1646_v62  ;;  %2969 = vpow2.f32 %v1663_v59  ;;  %v1754_v62 = vld [vmem:[#allocation4 + $0x38] sm:$0xff] }
 0x4c2   : > { %v1661_v6 = vmul.f32 1.442695, %v1644_v2 }
 0x4c3   : > { %2971 = vpow2.f32 %v1665_v4  ;;  %v1609_v7 = vpop.xlane.xlu0 %1608 }
 0x4c4   : > { %2973 = vpow2.f32 %v1661_v6  ;;  %v1647_v8 = vsub.f32 %v1491_v15, %v1609_v7 }
 0x4c5   : > { %v1612_v14 = vpop.xlane.xlu1 %1611 }
 0x4c6   : > { %v1667_v18 = vmul.f32 1.442695, %v1647_v8  ;;  %v1648_v19 = vsub.f32 %v1494_v34, %v1612_v14 }
 0x4c7   : > { %v1615_v20 = vpop.xlane.xlu0 %1614 }
 0x4c8   : > { %2975 = vpow2.f32 %v1667_v18  ;;  %v1669_v21 = vmul.f32 1.442695, %v1648_v19  ;;  %v1649_v22 = vsub.f32 %v4176_v50, %v1615_v20 }
 0x4c9   : > { %v1618_v26 = vpop.xlane.xlu1 %1617 }
 0x4ca   : > { %v2968_v27 = vpop.eup %2967  ;;  %2977 = vpow2.f32 %v1669_v21  ;;  %v1671_v28 = vmul.f32 1.442695, %v1649_v22  ;;  %v1650_v35 = vsub.f32 %v4178_v16, %v1618_v26 }
 0x4cb   : > { %v1691_v40 = vsel %vm540_vm1, %v2968_v27, 0.0  ;;  %v2970_v29 = vpop.eup %2969 }
 0x4cc   : > { %v1621_v36 = vpop.xlane.xlu0 %1620  ;;  %2979 = vpow2.f32 %v1671_v28  ;;  %v1673_v41 = vmul.f32 1.442695, %v1650_v35  ;;  %1692 = vadd.xlane.f32.xlu0 %v1691_v40  ;;  %v1697_v3 = vsel %vm540_vm1, %v2970_v29, 0.0 }
 0x4cd   : > { %v1651_v42 = vsub.f32 %v4188_v25, %v1621_v36  ;;  %v2972_v44 = vpop.eup %2971 }
 0x4ce   : > { %v1624_v45 = vpop.xlane.xlu1 %1623  ;;  %v2974_v48 = vpop.eup %2973  ;;  %v1740_v9 = vpack.c.bf16 %v2972_v44, %v2970_v29  ;;  %2981 = vpow2.f32 %v1673_v41  ;;  %v1700_v31 = vsel %vm540_vm1, %v2972_v44, 0.0  ;;  %v2961_v41 = vld [vmem:[#allocation19] sm:$0xff]   ;;  %v2963_v44 = vld [vmem:[#allocation19 + $0x10] sm:$0xff]  }
 0x4cf   : > { %v1675_v49 = vmul.f32 1.442695, %v1651_v42  ;;  %v1652_v11 = vsub.f32 %v4194_v10, %v1624_v45  ;;  %v1694_v12 = vsel %vm540_vm1, %v2974_v48, 0.0  ;;  %v1739_v13 = vpack.c.bf16 %v2974_v48, %v2968_v27  ;;  %v2962_v42 = vld [vmem:[#allocation19 + $0x8] sm:$0xff]   ;;  %2730 = vmatprep.subr.bf16.mxu0 %v2961_v41  ;;  %v2964_v45 = vld [vmem:[#allocation19 + $0x18] sm:$0xff]  }
 0x4d0   : > { %v1627_v63 = vpop.xlane.xlu0 %1626  ;;  %1698 = vadd.xlane.f32.xlu0 %v1697_v3  ;;  %1695 = vadd.xlane.f32.xlu1 %v1694_v12 }
 0x4d1   : > { %2983 = vpow2.f32 %v1675_v49  ;;  %v1677_v50 = vmul.f32 1.442695, %v1652_v11  ;;  %v1653_v15 = vsub.f32 %v4184_v24, %v1627_v63  ;;  %2706 = vmatprep.mubr.msk.bf16.mxu1 %vm540_vm1, %v1739_v13  ;;  %2731 = vmatpush3.bf16.msra.mxu0 %v2961_v41 }
 0x4d2   : > { %v1630_v16 = vpop.xlane.xlu1 %1629  ;;  %v2976_v17 = vpop.eup %2975  ;;  %2707 = vmatmul.mubr.msk.bf16.vlgmr.msra.gmra.mrb[28].mxu1 %vm540_vm1, %v1740_v9  ;;  %2732 = vmatprep.subr.bf16.mxu0 %v2962_v42 }
 0x4d3   : > { %2985 = vpow2.f32 %v1677_v50  ;;  %v1679_v34 = vmul.f32 1.442695, %v1653_v15  ;;  %v1654_v23 = vsub.f32 %v4190_v5, %v1630_v16  ;;  %2715 = vmatpush3.bf16.msra.mxu1 %v4165_v43  ;;  %v1703_v25 = vsel %vm540_vm1, %v2976_v17, 0.0 }
 0x4d4   : > { %v1633_v1 = vpop.xlane.xlu0 %1632  ;;  %v2978_v52 = vpop.eup %2977  ;;  %2716 = vmatprep.subr.bf16.mxu1 %v1752_v46  ;;  %1704 = vadd.xlane.f32.xlu0 %v1703_v25 }
 0x4d5   : > { %2987 = vpow2.f32 %v1679_v34  ;;  %v1681_v24 = vmul.f32 1.442695, %v1654_v23  ;;  %v1655_v10 = vsub.f32 %v4204_v33, %v1633_v1  ;;  %1701 = vadd.xlane.f32.xlu1 %v1700_v31  ;;  %v1741_v5 = vpack.c.bf16 %v2978_v52, %v2976_v17  ;;  %2733 = vmatpush3.bf16.msra.mxu0 %v2962_v42 }
 0x4d6   : > { %v1636_v53 = vpop.xlane.xlu1 %1635  ;;  %v2980_v30 = vpop.eup %2979  ;;  %v1706_v47 = vsel %vm540_vm1, %v2978_v52, 0.0  ;;  %2734 = vmatprep.subr.bf16.mxu0 %v2963_v44 }
 0x4d7   : > { %2989 = vpow2.f32 %v1681_v24  ;;  %v1683_v37 = vmul.f32 1.442695, %v1655_v10  ;;  %v1656_v43 = vsub.f32 %v4210_v38, %v1636_v53  ;;  %2717 = vmatpush3.bf16.msra.mxu1 %v1752_v46  ;;  %2710 = vmatprep.mubr.msk.bf16.mxu1 %vm540_vm1, %v1741_v5  ;;  %v1709_v54 = vsel %vm540_vm1, %v2980_v30, 0.0 }
 0x4d8   : > { %v1639_v51 = vpop.xlane.xlu0 %1638  ;;  %v2982_v56 = vpop.eup %2981  ;;  %2718 = vmatprep.subr.bf16.mxu1 %v1753_v39  ;;  %1710 = vadd.xlane.f32.xlu0 %v1709_v54 }
 0x4d9   : > { %2991 = vpow2.f32 %v1683_v37  ;;  %v1685_v33 = vmul.f32 1.442695, %v1656_v43  ;;  %v1657_v57 = vsub.f32 %v4200_v32, %v1639_v51  ;;  %1707 = vadd.xlane.f32.xlu1 %v1706_v47  ;;  %v1742_v59 = vpack.c.bf16 %v2982_v56, %v2980_v30  ;;  %2735 = vmatpush3.bf16.msra.mxu0 %v2963_v44 }
 0x4da   : > { %v1642_v58 = vpop.xlane.xlu1 %1641  ;;  %v1712_v32 = vsel %vm540_vm1, %v2982_v56, 0.0  ;;  %2736 = vmatprep.subr.bf16.mxu0 %v2964_v45 }
 0x4db   : > { %v2984_v38 = vpop.eup %2983  ;;  %2993 = vpow2.f32 %v1685_v33  ;;  %v1687_v60 = vmul.f32 1.442695, %v1657_v57  ;;  %v1658_v61 = vsub.f32 %v4206_v0, %v1642_v58  ;;  %2719 = vmatpush3.bf16.msra.mxu1 %v1753_v39 }
 0x4dc   : > { %v1715_v55 = vsel %vm540_vm1, %v2984_v38, 0.0  ;;  %2711 = vmatmul.mubr.msk.bf16.gmra.mrb[32].mxu1 %vm540_vm1, %v1742_v59  ;;  %2720 = vmatprep.subr.bf16.mxu1 %v1754_v62 }
 0x4dd   : > { %v2986_v2 = vpop.eup %2985  ;;  %2995 = vpow2.f32 %v1687_v60  ;;  %v1689_v4 = vmul.f32 1.442695, %v1658_v61  ;;  %1716 = vadd.xlane.f32.xlu0 %v1715_v55  ;;  %1713 = vadd.xlane.f32.xlu1 %v1712_v32 }
 0x4de   : > { %v1743_v6 = vpack.c.bf16 %v2986_v2, %v2984_v38  ;;  %v1718_v14 = vsel %vm540_vm1, %v2986_v2, 0.0  ;;  %2737 = vmatpush3.bf16.msra.mxu0 %v2964_v45 }
 0x4df   : > { %v2988_v7 = vpop.eup %2987  ;;  %2997 = vpow2.f32 %v1689_v4  ;;  %2721 = vmatpush3.bf16.msra.mxu1 %v1754_v62 }
 0x4e0   : > { %2722 = vmatprep.mubr.msk.bf16.mxu1 %vm540_vm1, %v1743_v6  ;;  %v1721_v0 = vsel %vm540_vm1, %v2988_v7, 0.0 }
 0x4e1   : > { %v2990_v8 = vpop.eup %2989  ;;  %1722 = vadd.xlane.f32.xlu0 %v1721_v0  ;;  %1719 = vadd.xlane.f32.xlu1 %v1718_v14 }
 0x4e2   : > { %v1744_v18 = vpack.c.bf16 %v2990_v8, %v2988_v7  ;;  %v1724_v22 = vsel %vm540_vm1, %v2990_v8, 0.0 }
 0x4e3   : > { %v2992_v19 = vpop.eup %2991 }
 0x4e4   : > { %v1727_v20 = vsel %vm540_vm1, %v2992_v19, 0.0  ;;  %2723 = vmatmul.mubr.msk.bf16.vlgmr.msra.gmra.mrb[36].mxu1 %vm540_vm1, %v1744_v18 }
 0x4e5   : > { %v2994_v21 = vpop.eup %2993  ;;  %1728 = vadd.xlane.f32.xlu0 %v1727_v20  ;;  %1725 = vadd.xlane.f32.xlu1 %v1724_v22 }
 0x4e6   : > { %v1745_v26 = vpack.c.bf16 %v2994_v21, %v2992_v19  ;;  %v1730_v36 = vsel %vm540_vm1, %v2994_v21, 0.0 }
 0x4e7   : > { %v2996_v27 = vpop.eup %2995 }
 0x4e8   : > { %2726 = vmatprep.mubr.msk.bf16.mxu1 %vm540_vm1, %v1745_v26  ;;  %v1733_v28 = vsel %vm540_vm1, %v2996_v27, 0.0 }
 0x4e9   : > { %v2998_v35 = vpop.eup %2997  ;;  %1734 = vadd.xlane.f32.xlu0 %v1733_v28  ;;  %1731 = vadd.xlane.f32.xlu1 %v1730_v36 }
 0x4ea   : > { %v1746_v40 = vpack.c.bf16 %v2998_v35, %v2996_v27  ;;  %v1736_v29 = vsel %vm540_vm1, %v2998_v35, 0.0 }
 0x4ec   : > { %2727 = vmatmul.mubr.msk.bf16.gmra.mrb[40].mxu1 %vm540_vm1, %v1746_v40 }
 0x4ed   : > { %1737 = vadd.xlane.f32.xlu1 %v1736_v29 }
 0x559   : > { %v1693_v48 = vpop.xlane.xlu0 %1692 }
 0x55a   : > { %2999 = vrcp.f32 %v1693_v48 }
 0x55d   : > { %v1696_v9 = vpop.xlane.xlu1 %1695  ;;  %v1699_v49 = vpop.xlane.xlu0 %1698 }
 0x55e   : > { %3001 = vrcp.f32 %v1699_v49 }
 0x561   : > { %v1705_v63 = vpop.xlane.xlu0 %1704 }
 0x562   : > { %v1702_v11 = vpop.xlane.xlu1 %1701 }
 0x563   : > { %3003 = vrcp.f32 %v1702_v11 }
 0x564   : > { %3005 = vrcp.f32 %v1696_v9  ;;  %v3000_v16 = vpop.eup %2999 }
 0x565   : > { %v1711_v12 = vpop.xlane.xlu0 %1710  ;;  %3007 = vrcp.f32 %v1705_v63 }
 0x566   : > { %v1708_v3 = vpop.xlane.xlu1 %1707  ;;  %3009 = vrcp.f32 %v1711_v12 }
 0x568   : > { %v3002_v34 = vpop.eup %3001 }
 0x56a   : > { %v1714_v13 = vpop.xlane.xlu1 %1713  ;;  %v1717_v50 = vpop.xlane.xlu0 %1716 }
 0x56b   : > { %3011 = vrcp.f32 %v1714_v13 }
 0x56c   : > { %3013 = vrcp.f32 %v1708_v3 }
 0x56d   : > { %v3004_v46 = vpop.eup %3003  ;;  %3015 = vrcp.f32 %v1717_v50  ;;  %v4261_v50 = vld [vmem:[#allocation20] ss:$0 sm:$0xff] }
 0x56e   : > { %v1720_v15 = vpop.xlane.xlu1 %1719  ;;  %v1723_v1 = vpop.xlane.xlu0 %1722 }
 0x56f   : > { %v3006_v52 = vpop.eup %3005  ;;  %3017 = vrcp.f32 %v1723_v1 }
 0x570   : > { %v3008_v54 = vpop.eup %3007 }
 0x571   : > { %v3010_v33 = vpop.eup %3009 }
 0x572   : > { %v1726_v24 = vpop.xlane.xlu1 %1725  ;;  %v1729_v39 = vpop.xlane.xlu0 %1728 }
 0x573   : > { %3019 = vrcp.f32 %v1726_v24 }
 0x574   : > { %3021 = vrcp.f32 %v1720_v15 }
 0x575   : > { %v3012_v47 = vpop.eup %3011  ;;  %3023 = vrcp.f32 %v1729_v39  ;;  %v2116_v39 = vld [vmem:[%s3837_s24 + $0x30] sm:$0xff] }
 0x576   : > { %v1732_v51 = vpop.xlane.xlu1 %1731  ;;  %v3014_v59 = vpop.eup %3013 }
 0x577   : > { %v1735_v62 = vpop.xlane.xlu0 %1734  ;;  %v3016_v7 = vpop.eup %3015 }
 0x578   : > { %3025 = vrcp.f32 %v1735_v62 }
 0x579   : > { %v3018_v8 = vpop.eup %3017 }
 0x57a   : > { %v1738_v4 = vpop.xlane.xlu1 %1737 }
 0x57b   : > { %3027 = vrcp.f32 %v1738_v4 }
 0x57c   : > { %3029 = vrcp.f32 %v1732_v51 }
 0x57d   : > { %v3020_v18 = vpop.eup %3019 }
 0x57e   : > { %v3022_v20 = vpop.eup %3021 }
 0x57f   : > { %v3024_v40 = vpop.eup %3023 }
 0x582   : > { %v3026_v41 = vpop.eup %3025 }
 0x585   : > { %v3028_v44 = vpop.eup %3027 }
 0x586   : > { %v3030_v48 = vpop.eup %3029 }
 0x5a5   : > { %v2708_v17 = vpop.f32.mrb[28].mxu1 }
 0x5a6   : > { %v1801_v23 = vpop.f32.mrb[29].mxu1  ;;  %v1927_v10 = vmul.f32 %v3002_v34, %v2708_v17 }
 0x5a7   : > { %v2709_v25 = vpop.f32.mrb[30].mxu1  ;;  %v1925_v5 = vmul.f32 %v3000_v16, %v1801_v23  ;;  %v2112_v16 = vld [vmem:[%s3837_s24 + $0x10] sm:$0xff]  ;;  %v2110_v23 = vld [vmem:[%s3837_s24] sm:$0xff] }
 0x5a8   : > { %v1928_v31 = vmul.f32 %v3004_v46, %v2709_v25  ;;  %v1804_v53 = vpop.f32.mrb[31].mxu1  ;;  %v2113_v25 = vld [vmem:[%s3837_s24 + $0x18] sm:$0xff] }
 0x5a9   : > { %v1926_v30 = vmul.f32 %v3006_v52, %v1804_v53 }
 0x5aa   : > { %v1942_v37 = vpack.c.bf16 %v1928_v31, %v1927_v10  ;;  %v2111_v31 = vld [vmem:[%s3837_s24 + $0x8] sm:$0xff] }
 0x5ab   : > { %v1941_v43 = vpack.c.bf16 %v1926_v30, %v1925_v5 }
 0x5ad   : > { %2738 = vmatprep.mubr.msk.bf16.mxu0 %vm540_vm1, %v1941_v43 }
 0x5ae   : > { %2739 = vmatmul.mubr.msk.bf16.vlgmr.msra.gmra.mrb[40].mxu0 %vm540_vm1, %v1942_v37 }
 0x5af   : > { %v2712_v56 = vpop.f32.mrb[32].mxu1 }
 0x5b0   : > { %v1817_v57 = vpop.f32.mrb[33].mxu1  ;;  %v1931_v38 = vmul.f32 %v3010_v33, %v2712_v56  ;;  %v2114_v56 = vld [vmem:[%s3837_s24 + $0x20] sm:$0xff] }
 0x5b1   : > { %v2713_v58 = vpop.f32.mrb[34].mxu1  ;;  %v1929_v55 = vmul.f32 %v3008_v54, %v1817_v57 }
 0x5b2   : > { %v1932_v60 = vmul.f32 %v3012_v47, %v2713_v58  ;;  %v1820_v61 = vpop.f32.mrb[35].mxu1  ;;  %v2117_v47 = vld [vmem:[%s3837_s24 + $0x38] sm:$0xff] }
 0x5b3   : > { %v1930_v2 = vmul.f32 %v3014_v59, %v1820_v61 }
 0x5b4   : > { %v1944_v32 = vpack.c.bf16 %v1932_v60, %v1931_v38  ;;  %v2115_v60 = vld [vmem:[%s3837_s24 + $0x28] sm:$0xff] }
 0x5b5   : > { %v1943_v6 = vpack.c.bf16 %v1930_v2, %v1929_v55 }
 0x5b7   : > { %v2724_v0 = vpop.f32.mrb[36].mxu1  ;;  %2742 = vmatprep.mubr.msk.bf16.mxu0 %vm540_vm1, %v1943_v6 }
 0x5b8   : > { %v1878_v14 = vpop.f32.mrb[37].mxu1  ;;  %2743 = vmatmul.mubr.msk.bf16.gmra.mrb[44].mxu0 %vm540_vm1, %v1944_v32  ;;  %v1935_v21 = vmul.f32 %v3018_v8, %v2724_v0  ;;  %v2120_v32 = vld [vmem:[%s3837_s24 + $0x50] sm:$0xff]  ;;  %v2118_v0 = vld [vmem:[%s3837_s24 + $0x40] sm:$0xff] }
 0x5b9   : > { %v2725_v19 = vpop.f32.mrb[38].mxu1  ;;  %v1933_v27 = vmul.f32 %v3016_v7, %v1878_v14 }
 0x5ba   : > { %v1936_v22 = vmul.f32 %v3020_v18, %v2725_v19  ;;  %v1881_v26 = vpop.f32.mrb[39].mxu1  ;;  %v2121_v18 = vld [vmem:[%s3837_s24 + $0x58] sm:$0xff] }
 0x5bb   : > { %v1934_v28 = vmul.f32 %v3022_v20, %v1881_v26 }
 0x5bc   : > { %v1946_v35 = vpack.c.bf16 %v1936_v22, %v1935_v21  ;;  %v2119_v22 = vld [vmem:[%s3837_s24 + $0x48] sm:$0xff] }
 0x5bd   : > { %v1945_v36 = vpack.c.bf16 %v1934_v28, %v1933_v27 }
 0x5bf   : > { %v2728_v29 = vpop.f32.mrb[40].mxu1  ;;  %2746 = vmatprep.mubr.msk.bf16.mxu0 %vm540_vm1, %v1945_v36 }
 0x5c0   : > { %v1894_v42 = vpop.f32.mrb[41].mxu1  ;;  %2747 = vmatmul.mubr.msk.bf16.gmra.mrb[48].mxu0 %vm540_vm1, %v1946_v35  ;;  %v1939_v9 = vmul.f32 %v3026_v41, %v2728_v29 }
 0x5c1   : > { %v2729_v45 = vpop.f32.mrb[42].mxu1  ;;  %v1937_v63 = vmul.f32 %v3024_v40, %v1894_v42  ;;  %v2124_v40 = vld [vmem:[%s3837_s24 + $0x70] sm:$0xff]  ;;  %v2122_v42 = vld [vmem:[%s3837_s24 + $0x60] sm:$0xff] }
 0x5c2   : > { %v1940_v49 = vmul.f32 %v3028_v44, %v2729_v45  ;;  %v1897_v11 = vpop.f32.mrb[43].mxu1 }
 0x5c3   : > { %v1938_v3 = vmul.f32 %v3030_v48, %v1897_v11  ;;  %v2125_v48 = vld [vmem:[%s3837_s24 + $0x78] sm:$0xff] }
 0x5c4   : > { %v1948_v12 = vpack.c.bf16 %v1940_v49, %v1939_v9 }
 0x5c5   : > { %v1947_v13 = vpack.c.bf16 %v1938_v3, %v1937_v63  ;;  %v2123_v63 = vld [vmem:[%s3837_s24 + $0x68] sm:$0xff]  ;;  %s3319_s24 = scalar_lea.vmem %s3318_s1, 4096 }
 0x5c6   : > { %p3321_p4 = scmp.lt.s32.totalorder %s3319_s24, %s3313_s10 }
 0x5c7   : > { %2750 = vmatprep.mubr.msk.bf16.mxu0 %vm540_vm1, %v1947_v13 }
 0x5c8   : > { %2751 = vmatmul.mubr.msk.bf16.gmra.mrb[52].mxu0 %vm540_vm1, %v1948_v12  ;;  %p3322_p9 = por %p3321_p4, %p3320_p2 }
 0x5ca   : > { %p3323_p8 = pnand %p3322_p9, %p3316_p11 }
 0x681   : > { %v2740_v15 = vpop.f32.mrb[40].mxu0 }
 0x682   : > { %v2055_v17 = vadd.f32 %v2740_v15, %v4261_v50  ;;  %v2046_v34 = vpop.f32.mrb[41].mxu0 }
 0x683   : > { %v2047_v46 = vadd.f32 %v4261_v50, %v2046_v34  ;;  %v2741_v1 = vpop.f32.mrb[42].mxu0 }
 0x684   : > { %v2128_v52 = vadd.f32 %v2112_v16, %v2055_v17  ;;  %v2058_v24 = vadd.f32 %v2741_v1, %v4261_v50  ;;  %v2049_v10 = vpop.f32.mrb[43].mxu0 }
 0x685   : > { %v2126_v53 = vadd.f32 %v2110_v23, %v2047_v46  ;;  %v2050_v5 = vadd.f32 %v4261_v50, %v2049_v10 }
 0x686   : > { %2144 = vst.msk [vmem:[%s4273_s20 + $0x10] sm:$0xff] %vm540_vm1, %v2128_v52  ;;  %v2129_v30 = vadd.f32 %v2113_v25, %v2058_v24 }
 0x687   : > { %2142 = vst.msk [vmem:[%s4273_s20] sm:$0xff] %vm540_vm1, %v2126_v53  ;;  %v2127_v37 = vadd.f32 %v2111_v31, %v2050_v5 }
 0x688   : > { %2145 = vst.msk [vmem:[%s4273_s20 + $0x18] sm:$0xff] %vm540_vm1, %v2129_v30 }
 0x689   : > { %2143 = vst.msk [vmem:[%s4273_s20 + $0x8] sm:$0xff] %vm540_vm1, %v2127_v37 }
 0x68b   : > { %v2744_v43 = vpop.f32.mrb[44].mxu0 }
 0x68c   : > { %v2071_v51 = vadd.f32 %v2744_v43, %v4261_v50  ;;  %v2062_v54 = vpop.f32.mrb[45].mxu0 }
 0x68d   : > { %v2063_v33 = vadd.f32 %v4261_v50, %v2062_v54  ;;  %v2745_v57 = vpop.f32.mrb[46].mxu0 }
 0x68e   : > { %v2132_v58 = vadd.f32 %v2116_v39, %v2071_v51  ;;  %v2074_v59 = vadd.f32 %v2745_v57, %v4261_v50  ;;  %v2065_v38 = vpop.f32.mrb[47].mxu0 }
 0x68f   : > { %v2130_v61 = vadd.f32 %v2114_v56, %v2063_v33  ;;  %v2066_v62 = vadd.f32 %v4261_v50, %v2065_v38 }
 0x690   : > { %2148 = vst.msk [vmem:[%s4273_s20 + $0x30] sm:$0xff] %vm540_vm1, %v2132_v58  ;;  %v2133_v55 = vadd.f32 %v2117_v47, %v2074_v59 }
 0x691   : > { %2146 = vst.msk [vmem:[%s4273_s20 + $0x20] sm:$0xff] %vm540_vm1, %v2130_v61  ;;  %v2131_v2 = vadd.f32 %v2115_v60, %v2066_v62 }
 0x692   : > { %2149 = vst.msk [vmem:[%s4273_s20 + $0x38] sm:$0xff] %vm540_vm1, %v2133_v55 }
 0x693   : > { %2147 = vst.msk [vmem:[%s4273_s20 + $0x28] sm:$0xff] %vm540_vm1, %v2131_v2  ;;  %v2748_v4 = vpop.f32.mrb[48].mxu0 }
 0x694   : > { %v2087_v6 = vadd.f32 %v2748_v4, %v4261_v50  ;;  %v2078_v7 = vpop.f32.mrb[49].mxu0 }
 0x695   : > { %v2079_v8 = vadd.f32 %v4261_v50, %v2078_v7  ;;  %v2749_v14 = vpop.f32.mrb[50].mxu0 }
 0x696   : > { %v2136_v19 = vadd.f32 %v2120_v32, %v2087_v6  ;;  %v2090_v20 = vadd.f32 %v2749_v14, %v4261_v50  ;;  %v2081_v21 = vpop.f32.mrb[51].mxu0 }
 0x697   : > { %v2134_v26 = vadd.f32 %v2118_v0, %v2079_v8  ;;  %v2082_v27 = vadd.f32 %v4261_v50, %v2081_v21 }
 0x698   : > { %2152 = vst.msk [vmem:[%s4273_s20 + $0x50] sm:$0xff] %vm540_vm1, %v2136_v19  ;;  %v2137_v28 = vadd.f32 %v2121_v18, %v2090_v20 }
 0x699   : > { %2150 = vst.msk [vmem:[%s4273_s20 + $0x40] sm:$0xff] %vm540_vm1, %v2134_v26  ;;  %v2135_v35 = vadd.f32 %v2119_v22, %v2082_v27 }
 0x69a   : > { %2153 = vst.msk [vmem:[%s4273_s20 + $0x58] sm:$0xff] %vm540_vm1, %v2137_v28 }
 0x69b   : > { %2151 = vst.msk [vmem:[%s4273_s20 + $0x48] sm:$0xff] %vm540_vm1, %v2135_v35  ;;  %v2752_v36 = vpop.f32.mrb[52].mxu0 }
 0x69c   : > { %v2103_v29 = vadd.f32 %v2752_v36, %v4261_v50  ;;  %v2094_v41 = vpop.f32.mrb[53].mxu0 }
 0x69d   : > { %v2095_v44 = vadd.f32 %v4261_v50, %v2094_v41  ;;  %v2753_v45 = vpop.f32.mrb[54].mxu0 }
 0x69e   : > { %v2140_v9 = vadd.f32 %v2124_v40, %v2103_v29  ;;  %v2106_v49 = vadd.f32 %v2753_v45, %v4261_v50  ;;  %v2097_v11 = vpop.f32.mrb[55].mxu0 }
 0x69f   : > { %v2138_v3 = vadd.f32 %v2122_v42, %v2095_v44  ;;  %v2098_v12 = vadd.f32 %v4261_v50, %v2097_v11 }
 0x6a0   : > { %2156 = vst.msk [vmem:[%s4273_s20 + $0x70] sm:$0xff] %vm540_vm1, %v2140_v9  ;;  %v2141_v13 = vadd.f32 %v2125_v48, %v2106_v49 }
 0x6a1   : > { %2154 = vst.msk [vmem:[%s4273_s20 + $0x60] sm:$0xff] %vm540_vm1, %v2138_v3  ;;  %v2139_v15 = vadd.f32 %v2123_v63, %v2098_v12 }
 0x6a2   : > { %2157 = vst.msk [vmem:[%s4273_s20 + $0x78] sm:$0xff] %vm540_vm1, %v2141_v13 }
 0x6a3   : > { %2155 = vst.msk [vmem:[%s4273_s20 + $0x68] sm:$0xff] %vm540_vm1, %v2139_v15 }
 0x6a4   : > { %3326 = shalt.err (!%p3323_p8)
}
 0x6a5   : > { %s3327_s20 = scalar_lea.hbm %s4330_s28, 2048  ;;  %s3331_s27 = scalar_lea.hbm %s4434_s29, 4096 }
 0x6a6   : > { %p3328_p3 = scmp.ne.s32.totalorder %s4330_s28, %s3327_s20  ;;  %p3332_p0 = scmp.lt.u32.totalorder %s4330_s28, %s4434_s29 }
 0x6a7   : > { %p3333_p1 = scmp.lt.u32.totalorder %s3331_s27, %s3327_s20  ;;  %p3335_p6 = scmp.lt.u32.totalorder %s3327_s20, %s4330_s28 }
 0x6a8   : > { %p3329_p12 = pnand %p3328_p3, %p4435_p5 }
 0x6a9   : > { %p3334_p7 = por %p3333_p1, %p3332_p0 }
 0x6aa   : > { %p3330_p13 = pneg %p3329_p12 }
 0x6ab   : > { %p3336_p10 = por %p3335_p6, %p3334_p7 }
 0x6ad   : > { %p3337_p11 = pnand %p3336_p10, %p3330_p13 }
 0x6af   : > { %3340 = shalt.err (!%p3337_p11)
}
 0x6b0   : > { %s3436_s10 = smov 128   ;;  %s3437_s1 = smov 8  }
 0x6b1   : > { %2824 = dma.vmem_to_hbm [thread:$0]  (%p4435_p5), %s4332_s19, 2048, %s4330_s28, %s2159_s23, %s3436_s10, %s3436_s10, %s3437_s1  }
 0x6b2 PF: > { %s2190_s24 = sand.u32 1, %s3395_s13   ;;  %p4436_p2 = scmp.ne.s32.totalorder %s4425_s21, 0 }
 0x6b3   : > { %p4437_p4 = scmp.ge.s32.totalorder %s3415_s18, 2  ;;  %s2191_s20 = scalar_lea.sflag [#allocation7], %s2190_s24 }
 0x6b5   : > { %p2859_p9 = pnand %p4437_p4, %p4436_p2 }
 0x6b7   : > { %3390 = dma.done.wait (!%p2859_p9), %s2191_s20, 2048  }
 0x6b8   : > { %3392 = vsyncadd (!%p2859_p9), %s2191_s20, 4294965248  ;;  %s31_s18 = sadd.s32 1, %s3415_s18   ;;  %s4438_s13 = smov %s3399_s14 }
 0x6b9   : > { %p28_p8 = scmp.ge.s32.totalorder %s31_s18, 4   ;;  %s4439_s14 = smov %s3403_s15 }
 0x6ba   : > { %s4440_s15 = smov %s3776_s3  ;;  %s4441_s16 = smov %s3411_s17 }
 0x6bb   : > { %s4442_s17 = smov %s4444_s0  ;;  %30 = sbr.rel (!%p28_p8) target bundleno = 16 (0x10), region = 147 }
 0x6c2   :  { %2196 = vsyncpa [#allocation6], 1 }
 0x6c3   :  { %2198 = vsyncpa [#allocation6 + $0x1], 1 }
 0x6c4   :  { %2199 = vsyncpa [#allocation9], 1 }
 0x6c5   :  { %2200 = vsyncpa [#allocation12], 1 }
 0x6c6   :  { %2201 = vsyncpa [#allocation15], 1 }
 0x6c7   :  { %2202 = vsyncpa [#allocation18], 1 }
 0x6c8   :  { %2203 = vsyncpa [#allocation21], 1 }
 0x6c9   :  { %2204 = vsyncpa [#allocation7], 1 }
 0x6ca   :  { %2206 = vsyncpa [#allocation7 + $0x1], 1 }

</bundles_post_ra>
